<compile_context>
chip_gen: v5e
topology: v5e:2x2
jax: 0.10.0
libtpu: 0.0.40
codegen_flags: <defaults>
</compile_context>

<pallas_src>
import functools
import math

import jax
import jax.numpy as jnp
from jax import lax
from jax.experimental import pallas as pl
from jax.experimental.pallas import tpu as pltpu


def _round_up(x, m):
    return (x + m - 1) // m * m


def _nbytes(shape, dtype):
    return math.prod(shape) * jnp.dtype(dtype).itemsize


def _device_kind():
    try:
        return jax.devices()[0].device_kind.lower()
    except Exception:
        return ""


def prepare_mhsa_params(w_qkv, b_qkv, w_proj, b_proj, *, num_heads):
    """One-time parameter preparation (do at load time, not per forward call):
    fold the softmax scale into the Q projection, split the fused QKV weight
    into Q / KV parts, and cast MXU operands to bf16 (biases stay f32)."""
    C = w_proj.shape[0]
    assert C % num_heads == 0, "C must be divisible by num_heads"
    scale = (C // num_heads) ** (-0.5)
    w_q = (w_qkv[:, :C] * scale).astype(jnp.bfloat16)            # (C, C)
    b_q = (b_qkv[:C] * scale).astype(jnp.float32).reshape(1, C)
    w_kv = w_qkv[:, C:].astype(jnp.bfloat16)                     # (C, 2C): K | V
    b_kv = b_qkv[C:].astype(jnp.float32).reshape(1, 2 * C)
    w_p = w_proj.astype(jnp.bfloat16)                            # (C, C)
    b_p = b_proj.astype(jnp.float32).reshape(1, C)
    return w_q, b_q, w_kv, b_kv, w_p, b_p


def _mhsa_kernel(x_ref, wq_ref, bq_ref, wkv_ref, bkv_ref, wp_ref, bp_ref,
                 o_ref, kv_ref, ctx_ref,
                 *, num_heads, head_dim, q_chunk, seq_len, n_pad):
    C = num_heads * head_dim
    align = q_chunk & (-q_chunk)            # largest power of two dividing q_chunk
    i = pl.program_id(1)                    # query-chunk index within this batch row

    # ---- K/V projection into the bf16 scratch, once per batch row ----------
    @pl.when(i == 0)
    def _():
        w_kv = wkv_ref[...]                 # (C, 2C) bf16 (VMEM resident)
        b_kv = bkv_ref[0]                   # (2C,)  f32

        def body(r, carry):
            r0 = pl.multiple_of(r * q_chunk, align)
            xr = x_ref[0, pl.ds(r0, q_chunk), :].astype(jnp.bfloat16)
            kv = jnp.dot(xr, w_kv, preferred_element_type=jnp.float32) + b_kv
            kv_ref[pl.ds(r0, q_chunk), :] = kv.astype(jnp.bfloat16)
            return carry

        lax.fori_loop(0, n_pad // q_chunk, body, 0)

    # ---- Q projection for this chunk (softmax scale already folded in) -----
    q0 = pl.multiple_of(i * q_chunk, align)
    xq = x_ref[0, pl.ds(q0, q_chunk), :].astype(jnp.bfloat16)        # (tq, C)
    q_all = (jnp.dot(xq, wq_ref[...], preferred_element_type=jnp.float32)
             + bq_ref[0]).astype(jnp.bfloat16)                       # (tq, C)

    if n_pad != seq_len:  # static: mask padded key positions
        kmask = lax.broadcasted_iota(jnp.int32, (q_chunk, n_pad), 1) < seq_len

    # ---- per-head attention; ctx written into its lane-column slice --------
    for h in range(num_heads):              # static, small (<= ~16 heads)
        c0 = h * head_dim
        c1 = c0 + head_dim
        qh = q_all[:, c0:c1]                # (tq, hd) bf16, pre-scaled
        kh = kv_ref[:, c0:c1]               # (n_pad, hd) bf16
        vh = kv_ref[:, C + c0:C + c1]       # (n_pad, hd) bf16

        # logits: contract the last dim of both operands (no kh.T materialized)
        s = lax.dot_general(qh, kh, (((1,), (1,)), ((), ())),
                            preferred_element_type=jnp.float32)      # (tq, n_pad)
        if n_pad != seq_len:
            s = jnp.where(kmask, s, -1e30)

        # numerically-stable softmax; elementwise math in f32; EUP reciprocal.
        s = s - jnp.max(s, axis=-1, keepdims=True)
        p = jnp.exp(s)
        p = p * pl.reciprocal(jnp.sum(p, axis=-1, keepdims=True), approx=True)

        ctx_ref[:, c0:c1] = jnp.dot(
            p.astype(jnp.bfloat16), vh,
            preferred_element_type=jnp.float32).astype(jnp.bfloat16)

    # ---- one full-depth output projection for the whole chunk --------------
    y = (jnp.dot(ctx_ref[...], wp_ref[...], preferred_element_type=jnp.float32)
         + bp_ref[0])
    o_ref[0] = y.astype(o_ref.dtype)


def mhsa_pallas(x, params, *, num_heads, q_chunk=None, vmem_limit_bytes=None):
    """x: (B, N, C).  params: output of prepare_mhsa_params()."""
    w_q, b_q, w_kv, b_kv, w_p, b_p = params
    B, N, C = x.shape
    assert C % num_heads == 0, "C must be divisible by num_heads"
    head_dim = C // num_heads

    kind = _device_kind()
    if q_chunk is None:
        # 256-row q tiles fill the 256-deep MXU on v6e/v7x; 128 on v5e & older.
        small_mxu = any(t in kind for t in ("v2", "v3", "v4", "v5"))
        q_chunk = 128 if small_mxu else 256
    q_chunk = min(q_chunk, _round_up(N, 8))
    n_pad = _round_up(N, q_chunk)
    n_chunks = n_pad // q_chunk

    if n_pad != N:
        x = jnp.pad(x, ((0, 0), (0, n_pad - N), (0, 0)))

    kernel = functools.partial(
        _mhsa_kernel, num_heads=num_heads, head_dim=head_dim,
        q_chunk=q_chunk, seq_len=N, n_pad=n_pad)

    # ---- cost estimate (helps XLA schedule around the custom call) ----------
    flops = B * (8 * n_pad * C * C + 4 * n_pad * n_pad * C)
    bytes_accessed = (_nbytes((B, n_pad, C), x.dtype)            # x in
                      + _nbytes((C, 3 * C), jnp.bfloat16)        # w_q | w_kv
                      + _nbytes((C, C), jnp.bfloat16)            # w_proj
                      + _nbytes((1, 4 * C), jnp.float32)         # biases
                      + _nbytes((B, n_pad, C), x.dtype))         # out
    cost = pl.CostEstimate(flops=int(flops),
                           transcendentals=int(B * num_heads * n_pad * n_pad),
                           bytes_accessed=int(bytes_accessed))

    # ---- VMEM budget (generation aware) -------------------------------------
    weight_bytes = (_nbytes((C, 3 * C), jnp.bfloat16)
                    + _nbytes((C, C), jnp.bfloat16)
                    + _nbytes((1, 4 * C), jnp.float32))
    resident = (2 * _nbytes((1, n_pad, C), x.dtype)        # x block (double-buffered)
                + 2 * _nbytes((1, q_chunk, C), x.dtype)    # out block (double-buffered)
                + 2 * weight_bytes                         # conservative (fallback path)
                + _nbytes((n_pad, 2 * C), jnp.bfloat16)    # K/V scratch
                + _nbytes((q_chunk, C), jnp.bfloat16))     # ctx scratch
    interm = (3 * _nbytes((q_chunk, n_pad), jnp.float32)   # logits / probs tiles
              + _nbytes((q_chunk, 2 * C), jnp.float32)     # K/V-projection transient
              + 2 * _nbytes((q_chunk, C), jnp.float32))    # Q projection / y
    if vmem_limit_bytes is None:
        if "v7" in kind:
            cap = 48 * 1024 * 1024          # leave headroom below 64 MiB physical
        elif "v2" in kind or "v3" in kind:
            cap = 14 * 1024 * 1024          # old gens: 16 MiB physical VMEM
        else:
            cap = 96 * 1024 * 1024          # v4/v5e/v6e: 128 MiB physical
        vmem_limit_bytes = int(min(cap, max(16 * 1024 * 1024,
                                            2 * (resident + interm))))

    out_shape = jax.ShapeDtypeStruct((B, n_pad, C), x.dtype)
    x_spec = pl.BlockSpec((1, n_pad, C), lambda b, i: (b, 0, 0))
    out_spec = pl.BlockSpec((1, q_chunk, C), lambda b, i: (b, i, 0))
    scratch = [pltpu.VMEM((n_pad, 2 * C), jnp.bfloat16),    # K | V (bf16)
               pltpu.VMEM((q_chunk, C), jnp.bfloat16)]      # per-chunk ctx

    def build(single_buffer_consts):
        kwargs = ({"pipeline_mode": pl.Buffered(1)}
                  if single_buffer_consts else {})

        def const_spec(shape):
            return pl.BlockSpec(shape, lambda b, i: (0,) * len(shape), **kwargs)

        in_specs = [x_spec,
                    const_spec((C, C)), const_spec((1, C)),          # w_q, b_q
                    const_spec((C, 2 * C)), const_spec((1, 2 * C)),  # w_kv, b_kv
                    const_spec((C, C)), const_spec((1, C))]          # w_proj, b_proj
        return pl.pallas_call(
            kernel,
            out_shape=out_shape,
            grid_spec=pltpu.PrefetchScalarGridSpec(
                num_scalar_prefetch=0,
                grid=(B, n_chunks),
                in_specs=in_specs,
                out_specs=out_spec,
                scratch_shapes=scratch),
            compiler_params=pltpu.CompilerParams(
                dimension_semantics=("parallel", "arbitrary"),
                vmem_limit_bytes=vmem_limit_bytes),
            cost_estimate=cost)

    args = (x, w_q, b_q, w_kv, b_kv, w_p, b_p)
    try:
        out = build(True)(*args)
    except Exception:
        # Installed JAX does not support single-buffered constant operands
        # (pipeline_mode=pl.Buffered(1)); fall back to default buffering.
        out = build(False)(*args)

    return out[:, :N, :] if n_pad != N else out


def mhsa_ref(x, w_qkv, b_qkv, w_proj, b_proj, *, num_heads):
    """Pure-JAX f32 reference mirroring the PyTorch forward."""
    B, N, C = x.shape
    hd = C // num_heads
    scale = hd ** (-0.5)
    qkv = x @ w_qkv + b_qkv                                     # (B, N, 3C)
    qkv = qkv.reshape(B, N, 3, num_heads, hd).transpose(2, 0, 3, 1, 4)
    q, k, v = qkv[0], qkv[1], qkv[2]                            # (B, H, N, hd)
    attn = jnp.einsum('bhqd,bhkd->bhqk', q, k) * scale
    attn = jax.nn.softmax(attn, axis=-1)
    ctx = jnp.einsum('bhqk,bhkd->bhqd', attn, v)                # (B, H, N, hd)
    ctx = ctx.transpose(0, 2, 1, 3).reshape(B, N, C)
    return ctx @ w_proj + b_proj


if __name__ == "__main__":
    # Small correctness config (C=32 is lane-underfull; real ViT C=768/1024
    # is 128-aligned — do not tune on this toy shape).
    B, N, C = 2, 8, 32
    num_heads = 4

    key = jax.random.PRNGKey(0)
    kx, kw1, kb1, kw2, kb2 = jax.random.split(key, 5)

    x = jax.random.normal(kx, (B, N, C), dtype=jnp.float32)

    # nn.Linear-style init: U(-1/sqrt(fan_in), 1/sqrt(fan_in)); stored as (in, out).
    bound = 1.0 / math.sqrt(C)
    w_qkv = jax.random.uniform(kw1, (C, 3 * C), jnp.float32, -bound, bound)
    b_qkv = jax.random.uniform(kb1, (3 * C,), jnp.float32, -bound, bound)
    w_proj = jax.random.uniform(kw2, (C, C), jnp.float32, -bound, bound)
    b_proj = jax.random.uniform(kb2, (C,), jnp.float32, -bound, bound)

    # Parameter prep (scale fold + bf16 cast + Q/KV split) happens ONCE here.
    params = prepare_mhsa_params(w_qkv, b_qkv, w_proj, b_proj, num_heads=num_heads)

    out = mhsa_pallas(x, params, num_heads=num_heads)
    out = jax.block_until_ready(out)

    ref = mhsa_ref(x, w_qkv, b_qkv, w_proj, b_proj, num_heads=num_heads)
    assert out.shape == (B, N, C)
    max_err = float(jnp.max(jnp.abs(out - ref)))
    # bf16 MXU operands with f32 accumulation (intentional precision choice):
    # tolerance loosened vs pure f32.
    assert jnp.allclose(out, ref, atol=3e-2, rtol=3e-2), \
        f"mismatch vs JAX reference (max abs err {max_err:.3e})"

    print("KERNEL_OK")
</pallas_src>

<mosaic_0001>
module attributes {stable_mosaic.version = 11 : i64} {
  func.func @_mhsa_kernel(%arg0: i32, %arg1: i32, %arg2: memref<1x8x32xf32, #tpu.memory_space<vmem>>, %arg3: memref<32x32xbf16, #tpu.memory_space<vmem>>, %arg4: memref<1x32xf32, #tpu.memory_space<vmem>>, %arg5: memref<32x64xbf16, #tpu.memory_space<vmem>>, %arg6: memref<1x64xf32, #tpu.memory_space<vmem>>, %arg7: memref<32x32xbf16, #tpu.memory_space<vmem>>, %arg8: memref<1x32xf32, #tpu.memory_space<vmem>>, %arg9: memref<1x8x32xf32, #tpu.memory_space<vmem>>, %arg10: memref<8x64xbf16, #tpu.memory_space<vmem>>, %arg11: memref<8x32xbf16, #tpu.memory_space<vmem>>) attributes {dimension_semantics = [#tpu.dimension_semantics<parallel>, #tpu.dimension_semantics<arbitrary>], iteration_bounds = array<i64: 2, 1>, scalar_prefetch = 0 : i64, scratch_operands = 2 : i64, tpu.core_type = #tpu.core_type<tc>, window_params = [{transform_indices = @transform_0, window_bounds = array<i64: 1, 8, 32>}, {pipeline_mode = #tpu.pipeline_mode<synchronous>, transform_indices = @transform_1, window_bounds = array<i64: 32, 32>}, {pipeline_mode = #tpu.pipeline_mode<synchronous>, transform_indices = @transform_2, window_bounds = array<i64: 1, 32>}, {pipeline_mode = #tpu.pipeline_mode<synchronous>, transform_indices = @transform_3, window_bounds = array<i64: 32, 64>}, {pipeline_mode = #tpu.pipeline_mode<synchronous>, transform_indices = @transform_4, window_bounds = array<i64: 1, 64>}, {pipeline_mode = #tpu.pipeline_mode<synchronous>, transform_indices = @transform_5, window_bounds = array<i64: 32, 32>}, {pipeline_mode = #tpu.pipeline_mode<synchronous>, transform_indices = @transform_6, window_bounds = array<i64: 1, 32>}, {transform_indices = @transform_7, window_bounds = array<i64: 1, 8, 32>}]} {
    %c0_i32 = arith.constant 0 : i32
    %0 = arith.cmpi eq, %arg1, %c0_i32 : i32
    %1 = arith.extui %0 : i1 to i32
    %c0_i32_0 = arith.constant 0 : i32
    %2 = arith.cmpi ne, %1, %c0_i32_0 : i32
    scf.if %2 {
      %c0_49 = arith.constant 0 : index
      %c0_50 = arith.constant 0 : index
      %100 = vector.load %arg5[%c0_49, %c0_50] : memref<32x64xbf16, #tpu.memory_space<vmem>>, vector<32x64xbf16>
      %c0_51 = arith.constant 0 : index
      %c0_52 = arith.constant 0 : index
      %101 = vector.load %arg6[%c0_51, %c0_52] : memref<1x64xf32, #tpu.memory_space<vmem>>, vector<1x64xf32>
      %102 = vector.shape_cast %101 : vector<1x64xf32> to vector<64xf32>
      %c0_i32_53 = arith.constant 0 : i32
      %c8_i32_54 = arith.constant 8 : i32
      %103 = arith.muli %c0_i32_53, %c8_i32_54 : i32
      %104 = tpu.assume_multiple %103, 8 : i32
      %c0_55 = arith.constant 0 : index
      %105 = arith.index_cast %104 : i32 to index
      %c0_56 = arith.constant 0 : index
      %106 = vector.load %arg2[%c0_55, %105, %c0_56] : memref<1x8x32xf32, #tpu.memory_space<vmem>>, vector<1x8x32xf32>
      %107 = vector.shape_cast %106 : vector<1x8x32xf32> to vector<8x32xf32>
      %108 = arith.truncf %107 : vector<8x32xf32> to vector<8x32xbf16>
      %cst_57 = arith.constant dense<0.000000e+00> : vector<8x64xf32>
      %109 = tpu.matmul %108, %100, %cst_57 {dimension_numbers = #tpu.dot_dimension_numbers<[1], [0], [0], [1], [0, 0, 1, 1], [], []>} : vector<8x32xbf16>, vector<32x64xbf16>, vector<8x64xf32> -> vector<8x64xf32>
      %110 = vector.shape_cast %102 : vector<64xf32> to vector<1x64xf32>
      %111 = vector.broadcast %110 : vector<1x64xf32> to vector<8x64xf32>
      %112 = arith.addf %109, %111 : vector<8x64xf32>
      %113 = arith.truncf %112 : vector<8x64xf32> to vector<8x64xbf16>
      %114 = arith.index_cast %104 : i32 to index
      %c0_58 = arith.constant 0 : index
      %115 = vector.load %arg10[%114, %c0_58] : memref<8x64xbf16, #tpu.memory_space<vmem>>, vector<8x64xbf16>
      tpu.vector_store %arg10[%114, %c0_58], %113 {strides = array<i32>} : memref<8x64xbf16, #tpu.memory_space<vmem>>, vector<8x64xbf16>,
      %c1_i32 = arith.constant 1 : i32
    } else {
    }
    %c8_i32 = arith.constant 8 : i32
    %3 = arith.muli %arg1, %c8_i32 : i32
    %4 = tpu.assume_multiple %3, 8 : i32
    %c0 = arith.constant 0 : index
    %5 = arith.index_cast %4 : i32 to index
    %c0_1 = arith.constant 0 : index
    %6 = vector.load %arg2[%c0, %5, %c0_1] : memref<1x8x32xf32, #tpu.memory_space<vmem>>, vector<1x8x32xf32>
    %7 = vector.shape_cast %6 : vector<1x8x32xf32> to vector<8x32xf32>
    %8 = arith.truncf %7 : vector<8x32xf32> to vector<8x32xbf16>
    %c0_2 = arith.constant 0 : index
    %c0_3 = arith.constant 0 : index
    %9 = vector.load %arg3[%c0_2, %c0_3] : memref<32x32xbf16, #tpu.memory_space<vmem>>, vector<32x32xbf16>
    %cst = arith.constant dense<0.000000e+00> : vector<8x32xf32>
    %10 = tpu.matmul %8, %9, %cst {dimension_numbers = #tpu.dot_dimension_numbers<[1], [0], [0], [1], [0, 0, 1, 1], [], []>} : vector<8x32xbf16>, vector<32x32xbf16>, vector<8x32xf32> -> vector<8x32xf32>
    %c0_4 = arith.constant 0 : index
    %c0_5 = arith.constant 0 : index
    %11 = vector.load %arg4[%c0_4, %c0_5] : memref<1x32xf32, #tpu.memory_space<vmem>>, vector<1x32xf32>
    %12 = vector.shape_cast %11 : vector<1x32xf32> to vector<32xf32>
    %13 = vector.shape_cast %12 : vector<32xf32> to vector<1x32xf32>
    %14 = vector.broadcast %13 : vector<1x32xf32> to vector<8x32xf32>
    %15 = arith.addf %10, %14 : vector<8x32xf32>
    %16 = arith.truncf %15 : vector<8x32xf32> to vector<8x32xbf16>
    %17 = vector.extract_strided_slice %16 {offsets = [0, 0], sizes = [8, 8], strides = [1, 1]} : vector<8x32xbf16> to vector<8x8xbf16>
    %c0_6 = arith.constant 0 : index
    %c0_7 = arith.constant 0 : index
    %18 = vector.load %arg10[%c0_6, %c0_7] : memref<8x64xbf16, #tpu.memory_space<vmem>>, vector<8x8xbf16>
    %c0_8 = arith.constant 0 : index
    %c32 = arith.constant 32 : index
    %19 = vector.load %arg10[%c0_8, %c32] : memref<8x64xbf16, #tpu.memory_space<vmem>>, vector<8x8xbf16>
    %cst_9 = arith.constant dense<0.000000e+00> : vector<8x8xf32>
    %20 = tpu.matmul %17, %18, %cst_9 {dimension_numbers = #tpu.dot_dimension_numbers<[1], [1], [0], [0], [0, 0, 1, 0], [], []>} : vector<8x8xbf16>, vector<8x8xbf16>, vector<8x8xf32> -> vector<8x8xf32>
    %cst_10 = arith.constant dense<0xFF800000> : vector<8xf32>
    %21 = vector.multi_reduction <maximumf>, %20, %cst_10 [1] : vector<8x8xf32> to vector<8xf32>
    %22 = vector.shape_cast %21 : vector<8xf32> to vector<8x1xf32>
    %23 = vector.broadcast %22 : vector<8x1xf32> to vector<8x8xf32>
    %24 = arith.subf %20, %23 : vector<8x8xf32>
    %25 = math.exp %24 : vector<8x8xf32>
    %cst_11 = arith.constant dense<0.000000e+00> : vector<8xf32>
    %26 = vector.multi_reduction <add>, %25, %cst_11 [1] : vector<8x8xf32> to vector<8xf32>
    %27 = vector.shape_cast %26 : vector<8xf32> to vector<8x1xf32>
    %28 = tpu.reciprocal %27 {approx = true} : vector<8x1xf32> -> vector<8x1xf32>
    %29 = vector.broadcast %28 : vector<8x1xf32> to vector<8x8xf32>
    %30 = arith.mulf %25, %29 : vector<8x8xf32>
    %31 = arith.truncf %30 : vector<8x8xf32> to vector<8x8xbf16>
    %cst_12 = arith.constant dense<0.000000e+00> : vector<8x8xf32>
    %32 = tpu.matmul %31, %19, %cst_12 {dimension_numbers = #tpu.dot_dimension_numbers<[1], [0], [0], [1], [0, 0, 1, 1], [], []>} : vector<8x8xbf16>, vector<8x8xbf16>, vector<8x8xf32> -> vector<8x8xf32>
    %33 = arith.truncf %32 : vector<8x8xf32> to vector<8x8xbf16>
    %c0_13 = arith.constant 0 : index
    %c0_14 = arith.constant 0 : index
    %34 = vector.load %arg11[%c0_13, %c0_14] : memref<8x32xbf16, #tpu.memory_space<vmem>>, vector<8x8xbf16>
    tpu.vector_store %arg11[%c0_13, %c0_14], %33 {strides = array<i32>} : memref<8x32xbf16, #tpu.memory_space<vmem>>, vector<8x8xbf16>,
    %35 = vector.extract_strided_slice %16 {offsets = [0, 8], sizes = [8, 8], strides = [1, 1]} : vector<8x32xbf16> to vector<8x8xbf16>
    %c0_15 = arith.constant 0 : index
    %c8 = arith.constant 8 : index
    %36 = vector.load %arg10[%c0_15, %c8] : memref<8x64xbf16, #tpu.memory_space<vmem>>, vector<8x8xbf16>
    %c0_16 = arith.constant 0 : index
    %c40 = arith.constant 40 : index
    %37 = vector.load %arg10[%c0_16, %c40] : memref<8x64xbf16, #tpu.memory_space<vmem>>, vector<8x8xbf16>
    %cst_17 = arith.constant dense<0.000000e+00> : vector<8x8xf32>
    %38 = tpu.matmul %35, %36, %cst_17 {dimension_numbers = #tpu.dot_dimension_numbers<[1], [1], [0], [0], [0, 0, 1, 0], [], []>} : vector<8x8xbf16>, vector<8x8xbf16>, vector<8x8xf32> -> vector<8x8xf32>
    %cst_18 = arith.constant dense<0xFF800000> : vector<8xf32>
    %39 = vector.multi_reduction <maximumf>, %38, %cst_18 [1] : vector<8x8xf32> to vector<8xf32>
    %40 = vector.shape_cast %39 : vector<8xf32> to vector<8x1xf32>
    %41 = vector.broadcast %40 : vector<8x1xf32> to vector<8x8xf32>
    %42 = arith.subf %38, %41 : vector<8x8xf32>
    %43 = math.exp %42 : vector<8x8xf32>
    %cst_19 = arith.constant dense<0.000000e+00> : vector<8xf32>
    %44 = vector.multi_reduction <add>, %43, %cst_19 [1] : vector<8x8xf32> to vector<8xf32>
    %45 = vector.shape_cast %44 : vector<8xf32> to vector<8x1xf32>
    %46 = tpu.reciprocal %45 {approx = true} : vector<8x1xf32> -> vector<8x1xf32>
    %47 = vector.broadcast %46 : vector<8x1xf32> to vector<8x8xf32>
    %48 = arith.mulf %43, %47 : vector<8x8xf32>
    %49 = arith.truncf %48 : vector<8x8xf32> to vector<8x8xbf16>
    %cst_20 = arith.constant dense<0.000000e+00> : vector<8x8xf32>
    %50 = tpu.matmul %49, %37, %cst_20 {dimension_numbers = #tpu.dot_dimension_numbers<[1], [0], [0], [1], [0, 0, 1, 1], [], []>} : vector<8x8xbf16>, vector<8x8xbf16>, vector<8x8xf32> -> vector<8x8xf32>
    %51 = arith.truncf %50 : vector<8x8xf32> to vector<8x8xbf16>
    %c0_21 = arith.constant 0 : index
    %c8_22 = arith.constant 8 : index
    %52 = vector.load %arg11[%c0_21, %c8_22] : memref<8x32xbf16, #tpu.memory_space<vmem>>, vector<8x8xbf16>
    tpu.vector_store %arg11[%c0_21, %c8_22], %51 {strides = array<i32>} : memref<8x32xbf16, #tpu.memory_space<vmem>>, vector<8x8xbf16>,
    %53 = vector.extract_strided_slice %16 {offsets = [0, 16], sizes = [8, 8], strides = [1, 1]} : vector<8x32xbf16> to vector<8x8xbf16>
    %c0_23 = arith.constant 0 : index
    %c16 = arith.constant 16 : index
    %54 = vector.load %arg10[%c0_23, %c16] : memref<8x64xbf16, #tpu.memory_space<vmem>>, vector<8x8xbf16>
    %c0_24 = arith.constant 0 : index
    %c48 = arith.constant 48 : index
    %55 = vector.load %arg10[%c0_24, %c48] : memref<8x64xbf16, #tpu.memory_space<vmem>>, vector<8x8xbf16>
    %cst_25 = arith.constant dense<0.000000e+00> : vector<8x8xf32>
    %56 = tpu.matmul %53, %54, %cst_25 {dimension_numbers = #tpu.dot_dimension_numbers<[1], [1], [0], [0], [0, 0, 1, 0], [], []>} : vector<8x8xbf16>, vector<8x8xbf16>, vector<8x8xf32> -> vector<8x8xf32>
    %cst_26 = arith.constant dense<0xFF800000> : vector<8xf32>
    %57 = vector.multi_reduction <maximumf>, %56, %cst_26 [1] : vector<8x8xf32> to vector<8xf32>
    %58 = vector.shape_cast %57 : vector<8xf32> to vector<8x1xf32>
    %59 = vector.broadcast %58 : vector<8x1xf32> to vector<8x8xf32>
    %60 = arith.subf %56, %59 : vector<8x8xf32>
    %61 = math.exp %60 : vector<8x8xf32>
    %cst_27 = arith.constant dense<0.000000e+00> : vector<8xf32>
    %62 = vector.multi_reduction <add>, %61, %cst_27 [1] : vector<8x8xf32> to vector<8xf32>
    %63 = vector.shape_cast %62 : vector<8xf32> to vector<8x1xf32>
    %64 = tpu.reciprocal %63 {approx = true} : vector<8x1xf32> -> vector<8x1xf32>
    %65 = vector.broadcast %64 : vector<8x1xf32> to vector<8x8xf32>
    %66 = arith.mulf %61, %65 : vector<8x8xf32>
    %67 = arith.truncf %66 : vector<8x8xf32> to vector<8x8xbf16>
    %cst_28 = arith.constant dense<0.000000e+00> : vector<8x8xf32>
    %68 = tpu.matmul %67, %55, %cst_28 {dimension_numbers = #tpu.dot_dimension_numbers<[1], [0], [0], [1], [0, 0, 1, 1], [], []>} : vector<8x8xbf16>, vector<8x8xbf16>, vector<8x8xf32> -> vector<8x8xf32>
    %69 = arith.truncf %68 : vector<8x8xf32> to vector<8x8xbf16>
    %c0_29 = arith.constant 0 : index
    %c16_30 = arith.constant 16 : index
    %70 = vector.load %arg11[%c0_29, %c16_30] : memref<8x32xbf16, #tpu.memory_space<vmem>>, vector<8x8xbf16>
    tpu.vector_store %arg11[%c0_29, %c16_30], %69 {strides = array<i32>} : memref<8x32xbf16, #tpu.memory_space<vmem>>, vector<8x8xbf16>,
    %71 = vector.extract_strided_slice %16 {offsets = [0, 24], sizes = [8, 8], strides = [1, 1]} : vector<8x32xbf16> to vector<8x8xbf16>
    %c0_31 = arith.constant 0 : index
    %c24 = arith.constant 24 : index
    %72 = vector.load %arg10[%c0_31, %c24] : memref<8x64xbf16, #tpu.memory_space<vmem>>, vector<8x8xbf16>
    %c0_32 = arith.constant 0 : index
    %c56 = arith.constant 56 : index
    %73 = vector.load %arg10[%c0_32, %c56] : memref<8x64xbf16, #tpu.memory_space<vmem>>, vector<8x8xbf16>
    %cst_33 = arith.constant dense<0.000000e+00> : vector<8x8xf32>
    %74 = tpu.matmul %71, %72, %cst_33 {dimension_numbers = #tpu.dot_dimension_numbers<[1], [1], [0], [0], [0, 0, 1, 0], [], []>} : vector<8x8xbf16>, vector<8x8xbf16>, vector<8x8xf32> -> vector<8x8xf32>
    %cst_34 = arith.constant dense<0xFF800000> : vector<8xf32>
    %75 = vector.multi_reduction <maximumf>, %74, %cst_34 [1] : vector<8x8xf32> to vector<8xf32>
    %76 = vector.shape_cast %75 : vector<8xf32> to vector<8x1xf32>
    %77 = vector.broadcast %76 : vector<8x1xf32> to vector<8x8xf32>
    %78 = arith.subf %74, %77 : vector<8x8xf32>
    %79 = math.exp %78 : vector<8x8xf32>
    %cst_35 = arith.constant dense<0.000000e+00> : vector<8xf32>
    %80 = vector.multi_reduction <add>, %79, %cst_35 [1] : vector<8x8xf32> to vector<8xf32>
    %81 = vector.shape_cast %80 : vector<8xf32> to vector<8x1xf32>
    %82 = tpu.reciprocal %81 {approx = true} : vector<8x1xf32> -> vector<8x1xf32>
    %83 = vector.broadcast %82 : vector<8x1xf32> to vector<8x8xf32>
    %84 = arith.mulf %79, %83 : vector<8x8xf32>
    %85 = arith.truncf %84 : vector<8x8xf32> to vector<8x8xbf16>
    %cst_36 = arith.constant dense<0.000000e+00> : vector<8x8xf32>
    %86 = tpu.matmul %85, %73, %cst_36 {dimension_numbers = #tpu.dot_dimension_numbers<[1], [0], [0], [1], [0, 0, 1, 1], [], []>} : vector<8x8xbf16>, vector<8x8xbf16>, vector<8x8xf32> -> vector<8x8xf32>
    %87 = arith.truncf %86 : vector<8x8xf32> to vector<8x8xbf16>
    %c0_37 = arith.constant 0 : index
    %c24_38 = arith.constant 24 : index
    %88 = vector.load %arg11[%c0_37, %c24_38] : memref<8x32xbf16, #tpu.memory_space<vmem>>, vector<8x8xbf16>
    tpu.vector_store %arg11[%c0_37, %c24_38], %87 {strides = array<i32>} : memref<8x32xbf16, #tpu.memory_space<vmem>>, vector<8x8xbf16>,
    %c0_39 = arith.constant 0 : index
    %c0_40 = arith.constant 0 : index
    %89 = vector.load %arg11[%c0_39, %c0_40] : memref<8x32xbf16, #tpu.memory_space<vmem>>, vector<8x32xbf16>
    %c0_41 = arith.constant 0 : index
    %c0_42 = arith.constant 0 : index
    %90 = vector.load %arg7[%c0_41, %c0_42] : memref<32x32xbf16, #tpu.memory_space<vmem>>, vector<32x32xbf16>
    %cst_43 = arith.constant dense<0.000000e+00> : vector<8x32xf32>
    %91 = tpu.matmul %89, %90, %cst_43 {dimension_numbers = #tpu.dot_dimension_numbers<[1], [0], [0], [1], [0, 0, 1, 1], [], []>} : vector<8x32xbf16>, vector<32x32xbf16>, vector<8x32xf32> -> vector<8x32xf32>
    %c0_44 = arith.constant 0 : index
    %c0_45 = arith.constant 0 : index
    %92 = vector.load %arg8[%c0_44, %c0_45] : memref<1x32xf32, #tpu.memory_space<vmem>>, vector<1x32xf32>
    %93 = vector.shape_cast %92 : vector<1x32xf32> to vector<32xf32>
    %94 = vector.shape_cast %93 : vector<32xf32> to vector<1x32xf32>
    %95 = vector.broadcast %94 : vector<1x32xf32> to vector<8x32xf32>
    %96 = arith.addf %91, %95 : vector<8x32xf32>
    %c0_46 = arith.constant 0 : index
    %c0_47 = arith.constant 0 : index
    %c0_48 = arith.constant 0 : index
    %97 = vector.load %arg9[%c0_46, %c0_47, %c0_48] : memref<1x8x32xf32, #tpu.memory_space<vmem>>, vector<1x8x32xf32>
    %98 = vector.shape_cast %97 : vector<1x8x32xf32> to vector<8x32xf32>
    %99 = vector.shape_cast %96 : vector<8x32xf32> to vector<1x8x32xf32>
    tpu.vector_store %arg9[%c0_46, %c0_47, %c0_48], %99 {strides = array<i32>} : memref<1x8x32xf32, #tpu.memory_space<vmem>>, vector<1x8x32xf32>,
    return
  }
  func.func @transform_0(%arg0: i32, %arg1: i32) -> (i32, i32, i32) {
    %c0_i32 = arith.constant 0 : i32
    %c0_i32_0 = arith.constant 0 : i32
    %c0_i32_1 = arith.constant 0 : i32
    return %arg0, %c0_i32, %c0_i32_0 : i32, i32, i32
  }
  func.func @transform_1(%arg0: i32, %arg1: i32) -> (i32, i32) {
    %c0_i32 = arith.constant 0 : i32
    %c0_i32_0 = arith.constant 0 : i32
    %c0_i32_1 = arith.constant 0 : i32
    return %c0_i32, %c0_i32_0 : i32, i32
  }
  func.func @transform_2(%arg0: i32, %arg1: i32) -> (i32, i32) {
    %c0_i32 = arith.constant 0 : i32
    %c0_i32_0 = arith.constant 0 : i32
    %c0_i32_1 = arith.constant 0 : i32
    return %c0_i32, %c0_i32_0 : i32, i32
  }
  func.func @transform_3(%arg0: i32, %arg1: i32) -> (i32, i32) {
    %c0_i32 = arith.constant 0 : i32
    %c0_i32_0 = arith.constant 0 : i32
    %c0_i32_1 = arith.constant 0 : i32
    return %c0_i32, %c0_i32_0 : i32, i32
  }
  func.func @transform_4(%arg0: i32, %arg1: i32) -> (i32, i32) {
    %c0_i32 = arith.constant 0 : i32
    %c0_i32_0 = arith.constant 0 : i32
    %c0_i32_1 = arith.constant 0 : i32
    return %c0_i32, %c0_i32_0 : i32, i32
  }
  func.func @transform_5(%arg0: i32, %arg1: i32) -> (i32, i32) {
    %c0_i32 = arith.constant 0 : i32
    %c0_i32_0 = arith.constant 0 : i32
    %c0_i32_1 = arith.constant 0 : i32
    return %c0_i32, %c0_i32_0 : i32, i32
  }
  func.func @transform_6(%arg0: i32, %arg1: i32) -> (i32, i32) {
    %c0_i32 = arith.constant 0 : i32
    %c0_i32_0 = arith.constant 0 : i32
    %c0_i32_1 = arith.constant 0 : i32
    return %c0_i32, %c0_i32_0 : i32, i32
  }
  func.func @transform_7(%arg0: i32, %arg1: i32) -> (i32, i32, i32) {
    %c0_i32 = arith.constant 0 : i32
    %c0_i32_0 = arith.constant 0 : i32
    return %arg0, %arg1, %c0_i32 : i32, i32, i32
  }
}

module attributes {stable_mosaic.version = 11 : i64} {
  func.func @_mhsa_kernel(%arg0: i32, %arg1: i32, %arg2: memref<1x8x32xf32, #tpu.memory_space<vmem>>, %arg3: memref<32x32xbf16, #tpu.memory_space<vmem>>, %arg4: memref<1x32xf32, #tpu.memory_space<vmem>>, %arg5: memref<32x64xbf16, #tpu.memory_space<vmem>>, %arg6: memref<1x64xf32, #tpu.memory_space<vmem>>, %arg7: memref<32x32xbf16, #tpu.memory_space<vmem>>, %arg8: memref<1x32xf32, #tpu.memory_space<vmem>>, %arg9: memref<1x8x32xf32, #tpu.memory_space<vmem>>, %arg10: memref<8x64xbf16, #tpu.memory_space<vmem>>, %arg11: memref<8x32xbf16, #tpu.memory_space<vmem>>) attributes {dimension_semantics = [#tpu.dimension_semantics<parallel>, #tpu.dimension_semantics<arbitrary>], iteration_bounds = array<i64: 2, 1>, scalar_prefetch = 0 : i64, scratch_operands = 2 : i64, tpu.core_type = #tpu.core_type<tc>, window_params = [{transform_indices = @transform_0, window_bounds = array<i64: 1, 8, 32>}, {pipeline_mode = #tpu.pipeline_mode<synchronous>, transform_indices = @transform_1, window_bounds = array<i64: 32, 32>}, {pipeline_mode = #tpu.pipeline_mode<synchronous>, transform_indices = @transform_2, window_bounds = array<i64: 1, 32>}, {pipeline_mode = #tpu.pipeline_mode<synchronous>, transform_indices = @transform_3, window_bounds = array<i64: 32, 64>}, {pipeline_mode = #tpu.pipeline_mode<synchronous>, transform_indices = @transform_4, window_bounds = array<i64: 1, 64>}, {pipeline_mode = #tpu.pipeline_mode<synchronous>, transform_indices = @transform_5, window_bounds = array<i64: 32, 32>}, {pipeline_mode = #tpu.pipeline_mode<synchronous>, transform_indices = @transform_6, window_bounds = array<i64: 1, 32>}, {transform_indices = @transform_7, window_bounds = array<i64: 1, 8, 32>}]} {
    %c0_i32 = arith.constant 0 : i32
    %0 = arith.cmpi eq, %arg1, %c0_i32 : i32
    %1 = arith.extui %0 : i1 to i32
    %c0_i32_0 = arith.constant 0 : i32
    %2 = arith.cmpi ne, %1, %c0_i32_0 : i32
    scf.if %2 {
      %c0_49 = arith.constant 0 : index
      %c0_50 = arith.constant 0 : index
      %100 = vector.load %arg5[%c0_49, %c0_50] : memref<32x64xbf16, #tpu.memory_space<vmem>>, vector<32x64xbf16>
      %c0_51 = arith.constant 0 : index
      %c0_52 = arith.constant 0 : index
      %101 = vector.load %arg6[%c0_51, %c0_52] : memref<1x64xf32, #tpu.memory_space<vmem>>, vector<1x64xf32>
      %102 = vector.shape_cast %101 : vector<1x64xf32> to vector<64xf32>
      %c0_i32_53 = arith.constant 0 : i32
      %c8_i32_54 = arith.constant 8 : i32
      %103 = arith.muli %c0_i32_53, %c8_i32_54 : i32
      %104 = tpu.assume_multiple %103, 8 : i32
      %c0_55 = arith.constant 0 : index
      %105 = arith.index_cast %104 : i32 to index
      %c0_56 = arith.constant 0 : index
      %106 = vector.load %arg2[%c0_55, %105, %c0_56] : memref<1x8x32xf32, #tpu.memory_space<vmem>>, vector<1x8x32xf32>
      %107 = vector.shape_cast %106 : vector<1x8x32xf32> to vector<8x32xf32>
      %108 = arith.truncf %107 : vector<8x32xf32> to vector<8x32xbf16>
      %cst_57 = arith.constant dense<0.000000e+00> : vector<8x64xf32>
      %109 = tpu.matmul %108, %100, %cst_57 {dimension_numbers = #tpu.dot_dimension_numbers<[1], [0], [0], [1], [0, 0, 1, 1], [], []>} : vector<8x32xbf16>, vector<32x64xbf16>, vector<8x64xf32> -> vector<8x64xf32>
      %110 = vector.shape_cast %102 : vector<64xf32> to vector<1x64xf32>
      %111 = vector.broadcast %110 : vector<1x64xf32> to vector<8x64xf32>
      %112 = arith.addf %109, %111 : vector<8x64xf32>
      %113 = arith.truncf %112 : vector<8x64xf32> to vector<8x64xbf16>
      %114 = arith.index_cast %104 : i32 to index
      %c0_58 = arith.constant 0 : index
      %115 = vector.load %arg10[%114, %c0_58] : memref<8x64xbf16, #tpu.memory_space<vmem>>, vector<8x64xbf16>
      tpu.vector_store %arg10[%114, %c0_58], %113 {strides = array<i32>} : memref<8x64xbf16, #tpu.memory_space<vmem>>, vector<8x64xbf16>,
      %c1_i32 = arith.constant 1 : i32
    } else {
    }
    %c8_i32 = arith.constant 8 : i32
    %3 = arith.muli %arg1, %c8_i32 : i32
    %4 = tpu.assume_multiple %3, 8 : i32
    %c0 = arith.constant 0 : index
    %5 = arith.index_cast %4 : i32 to index
    %c0_1 = arith.constant 0 : index
    %6 = vector.load %arg2[%c0, %5, %c0_1] : memref<1x8x32xf32, #tpu.memory_space<vmem>>, vector<1x8x32xf32>
    %7 = vector.shape_cast %6 : vector<1x8x32xf32> to vector<8x32xf32>
    %8 = arith.truncf %7 : vector<8x32xf32> to vector<8x32xbf16>
    %c0_2 = arith.constant 0 : index
    %c0_3 = arith.constant 0 : index
    %9 = vector.load %arg3[%c0_2, %c0_3] : memref<32x32xbf16, #tpu.memory_space<vmem>>, vector<32x32xbf16>
    %cst = arith.constant dense<0.000000e+00> : vector<8x32xf32>
    %10 = tpu.matmul %8, %9, %cst {dimension_numbers = #tpu.dot_dimension_numbers<[1], [0], [0], [1], [0, 0, 1, 1], [], []>} : vector<8x32xbf16>, vector<32x32xbf16>, vector<8x32xf32> -> vector<8x32xf32>
    %c0_4 = arith.constant 0 : index
    %c0_5 = arith.constant 0 : index
    %11 = vector.load %arg4[%c0_4, %c0_5] : memref<1x32xf32, #tpu.memory_space<vmem>>, vector<1x32xf32>
    %12 = vector.shape_cast %11 : vector<1x32xf32> to vector<32xf32>
    %13 = vector.shape_cast %12 : vector<32xf32> to vector<1x32xf32>
    %14 = vector.broadcast %13 : vector<1x32xf32> to vector<8x32xf32>
    %15 = arith.addf %10, %14 : vector<8x32xf32>
    %16 = arith.truncf %15 : vector<8x32xf32> to vector<8x32xbf16>
    %17 = vector.extract_strided_slice %16 {offsets = [0, 0], sizes = [8, 8], strides = [1, 1]} : vector<8x32xbf16> to vector<8x8xbf16>
    %c0_6 = arith.constant 0 : index
    %c0_7 = arith.constant 0 : index
    %18 = vector.load %arg10[%c0_6, %c0_7] : memref<8x64xbf16, #tpu.memory_space<vmem>>, vector<8x8xbf16>
    %c0_8 = arith.constant 0 : index
    %c32 = arith.constant 32 : index
    %19 = vector.load %arg10[%c0_8, %c32] : memref<8x64xbf16, #tpu.memory_space<vmem>>, vector<8x8xbf16>
    %cst_9 = arith.constant dense<0.000000e+00> : vector<8x8xf32>
    %20 = tpu.matmul %17, %18, %cst_9 {dimension_numbers = #tpu.dot_dimension_numbers<[1], [1], [0], [0], [0, 0, 1, 0], [], []>} : vector<8x8xbf16>, vector<8x8xbf16>, vector<8x8xf32> -> vector<8x8xf32>
    %cst_10 = arith.constant dense<0xFF800000> : vector<8xf32>
    %21 = vector.multi_reduction <maximumf>, %20, %cst_10 [1] : vector<8x8xf32> to vector<8xf32>
    %22 = vector.shape_cast %21 : vector<8xf32> to vector<8x1xf32>
    %23 = vector.broadcast %22 : vector<8x1xf32> to vector<8x8xf32>
    %24 = arith.subf %20, %23 : vector<8x8xf32>
    %25 = math.exp %24 : vector<8x8xf32>
    %cst_11 = arith.constant dense<0.000000e+00> : vector<8xf32>
    %26 = vector.multi_reduction <add>, %25, %cst_11 [1] : vector<8x8xf32> to vector<8xf32>
    %27 = vector.shape_cast %26 : vector<8xf32> to vector<8x1xf32>
    %28 = tpu.reciprocal %27 {approx = true} : vector<8x1xf32> -> vector<8x1xf32>
    %29 = vector.broadcast %28 : vector<8x1xf32> to vector<8x8xf32>
    %30 = arith.mulf %25, %29 : vector<8x8xf32>
    %31 = arith.truncf %30 : vector<8x8xf32> to vector<8x8xbf16>
    %cst_12 = arith.constant dense<0.000000e+00> : vector<8x8xf32>
    %32 = tpu.matmul %31, %19, %cst_12 {dimension_numbers = #tpu.dot_dimension_numbers<[1], [0], [0], [1], [0, 0, 1, 1], [], []>} : vector<8x8xbf16>, vector<8x8xbf16>, vector<8x8xf32> -> vector<8x8xf32>
    %33 = arith.truncf %32 : vector<8x8xf32> to vector<8x8xbf16>
    %c0_13 = arith.constant 0 : index
    %c0_14 = arith.constant 0 : index
    %34 = vector.load %arg11[%c0_13, %c0_14] : memref<8x32xbf16, #tpu.memory_space<vmem>>, vector<8x8xbf16>
    tpu.vector_store %arg11[%c0_13, %c0_14], %33 {strides = array<i32>} : memref<8x32xbf16, #tpu.memory_space<vmem>>, vector<8x8xbf16>,
    %35 = vector.extract_strided_slice %16 {offsets = [0, 8], sizes = [8, 8], strides = [1, 1]} : vector<8x32xbf16> to vector<8x8xbf16>
    %c0_15 = arith.constant 0 : index
    %c8 = arith.constant 8 : index
    %36 = vector.load %arg10[%c0_15, %c8] : memref<8x64xbf16, #tpu.memory_space<vmem>>, vector<8x8xbf16>
    %c0_16 = arith.constant 0 : index
    %c40 = arith.constant 40 : index
    %37 = vector.load %arg10[%c0_16, %c40] : memref<8x64xbf16, #tpu.memory_space<vmem>>, vector<8x8xbf16>
    %cst_17 = arith.constant dense<0.000000e+00> : vector<8x8xf32>
    %38 = tpu.matmul %35, %36, %cst_17 {dimension_numbers = #tpu.dot_dimension_numbers<[1], [1], [0], [0], [0, 0, 1, 0], [], []>} : vector<8x8xbf16>, vector<8x8xbf16>, vector<8x8xf32> -> vector<8x8xf32>
    %cst_18 = arith.constant dense<0xFF800000> : vector<8xf32>
    %39 = vector.multi_reduction <maximumf>, %38, %cst_18 [1] : vector<8x8xf32> to vector<8xf32>
    %40 = vector.shape_cast %39 : vector<8xf32> to vector<8x1xf32>
    %41 = vector.broadcast %40 : vector<8x1xf32> to vector<8x8xf32>
    %42 = arith.subf %38, %41 : vector<8x8xf32>
    %43 = math.exp %42 : vector<8x8xf32>
    %cst_19 = arith.constant dense<0.000000e+00> : vector<8xf32>
    %44 = vector.multi_reduction <add>, %43, %cst_19 [1] : vector<8x8xf32> to vector<8xf32>
    %45 = vector.shape_cast %44 : vector<8xf32> to vector<8x1xf32>
    %46 = tpu.reciprocal %45 {approx = true} : vector<8x1xf32> -> vector<8x1xf32>
    %47 = vector.broadcast %46 : vector<8x1xf32> to vector<8x8xf32>
    %48 = arith.mulf %43, %47 : vector<8x8xf32>
    %49 = arith.truncf %48 : vector<8x8xf32> to vector<8x8xbf16>
    %cst_20 = arith.constant dense<0.000000e+00> : vector<8x8xf32>
    %50 = tpu.matmul %49, %37, %cst_20 {dimension_numbers = #tpu.dot_dimension_numbers<[1], [0], [0], [1], [0, 0, 1, 1], [], []>} : vector<8x8xbf16>, vector<8x8xbf16>, vector<8x8xf32> -> vector<8x8xf32>
    %51 = arith.truncf %50 : vector<8x8xf32> to vector<8x8xbf16>
    %c0_21 = arith.constant 0 : index
    %c8_22 = arith.constant 8 : index
    %52 = vector.load %arg11[%c0_21, %c8_22] : memref<8x32xbf16, #tpu.memory_space<vmem>>, vector<8x8xbf16>
    tpu.vector_store %arg11[%c0_21, %c8_22], %51 {strides = array<i32>} : memref<8x32xbf16, #tpu.memory_space<vmem>>, vector<8x8xbf16>,
    %53 = vector.extract_strided_slice %16 {offsets = [0, 16], sizes = [8, 8], strides = [1, 1]} : vector<8x32xbf16> to vector<8x8xbf16>
    %c0_23 = arith.constant 0 : index
    %c16 = arith.constant 16 : index
    %54 = vector.load %arg10[%c0_23, %c16] : memref<8x64xbf16, #tpu.memory_space<vmem>>, vector<8x8xbf16>
    %c0_24 = arith.constant 0 : index
    %c48 = arith.constant 48 : index
    %55 = vector.load %arg10[%c0_24, %c48] : memref<8x64xbf16, #tpu.memory_space<vmem>>, vector<8x8xbf16>
    %cst_25 = arith.constant dense<0.000000e+00> : vector<8x8xf32>
    %56 = tpu.matmul %53, %54, %cst_25 {dimension_numbers = #tpu.dot_dimension_numbers<[1], [1], [0], [0], [0, 0, 1, 0], [], []>} : vector<8x8xbf16>, vector<8x8xbf16>, vector<8x8xf32> -> vector<8x8xf32>
    %cst_26 = arith.constant dense<0xFF800000> : vector<8xf32>
    %57 = vector.multi_reduction <maximumf>, %56, %cst_26 [1] : vector<8x8xf32> to vector<8xf32>
    %58 = vector.shape_cast %57 : vector<8xf32> to vector<8x1xf32>
    %59 = vector.broadcast %58 : vector<8x1xf32> to vector<8x8xf32>
    %60 = arith.subf %56, %59 : vector<8x8xf32>
    %61 = math.exp %60 : vector<8x8xf32>
    %cst_27 = arith.constant dense<0.000000e+00> : vector<8xf32>
    %62 = vector.multi_reduction <add>, %61, %cst_27 [1] : vector<8x8xf32> to vector<8xf32>
    %63 = vector.shape_cast %62 : vector<8xf32> to vector<8x1xf32>
    %64 = tpu.reciprocal %63 {approx = true} : vector<8x1xf32> -> vector<8x1xf32>
    %65 = vector.broadcast %64 : vector<8x1xf32> to vector<8x8xf32>
    %66 = arith.mulf %61, %65 : vector<8x8xf32>
    %67 = arith.truncf %66 : vector<8x8xf32> to vector<8x8xbf16>
    %cst_28 = arith.constant dense<0.000000e+00> : vector<8x8xf32>
    %68 = tpu.matmul %67, %55, %cst_28 {dimension_numbers = #tpu.dot_dimension_numbers<[1], [0], [0], [1], [0, 0, 1, 1], [], []>} : vector<8x8xbf16>, vector<8x8xbf16>, vector<8x8xf32> -> vector<8x8xf32>
    %69 = arith.truncf %68 : vector<8x8xf32> to vector<8x8xbf16>
    %c0_29 = arith.constant 0 : index
    %c16_30 = arith.constant 16 : index
    %70 = vector.load %arg11[%c0_29, %c16_30] : memref<8x32xbf16, #tpu.memory_space<vmem>>, vector<8x8xbf16>
    tpu.vector_store %arg11[%c0_29, %c16_30], %69 {strides = array<i32>} : memref<8x32xbf16, #tpu.memory_space<vmem>>, vector<8x8xbf16>,
    %71 = vector.extract_strided_slice %16 {offsets = [0, 24], sizes = [8, 8], strides = [1, 1]} : vector<8x32xbf16> to vector<8x8xbf16>
    %c0_31 = arith.constant 0 : index
    %c24 = arith.constant 24 : index
    %72 = vector.load %arg10[%c0_31, %c24] : memref<8x64xbf16, #tpu.memory_space<vmem>>, vector<8x8xbf16>
    %c0_32 = arith.constant 0 : index
    %c56 = arith.constant 56 : index
    %73 = vector.load %arg10[%c0_32, %c56] : memref<8x64xbf16, #tpu.memory_space<vmem>>, vector<8x8xbf16>
    %cst_33 = arith.constant dense<0.000000e+00> : vector<8x8xf32>
    %74 = tpu.matmul %71, %72, %cst_33 {dimension_numbers = #tpu.dot_dimension_numbers<[1], [1], [0], [0], [0, 0, 1, 0], [], []>} : vector<8x8xbf16>, vector<8x8xbf16>, vector<8x8xf32> -> vector<8x8xf32>
    %cst_34 = arith.constant dense<0xFF800000> : vector<8xf32>
    %75 = vector.multi_reduction <maximumf>, %74, %cst_34 [1] : vector<8x8xf32> to vector<8xf32>
    %76 = vector.shape_cast %75 : vector<8xf32> to vector<8x1xf32>
    %77 = vector.broadcast %76 : vector<8x1xf32> to vector<8x8xf32>
    %78 = arith.subf %74, %77 : vector<8x8xf32>
    %79 = math.exp %78 : vector<8x8xf32>
    %cst_35 = arith.constant dense<0.000000e+00> : vector<8xf32>
    %80 = vector.multi_reduction <add>, %79, %cst_35 [1] : vector<8x8xf32> to vector<8xf32>
    %81 = vector.shape_cast %80 : vector<8xf32> to vector<8x1xf32>
    %82 = tpu.reciprocal %81 {approx = true} : vector<8x1xf32> -> vector<8x1xf32>
    %83 = vector.broadcast %82 : vector<8x1xf32> to vector<8x8xf32>
    %84 = arith.mulf %79, %83 : vector<8x8xf32>
    %85 = arith.truncf %84 : vector<8x8xf32> to vector<8x8xbf16>
    %cst_36 = arith.constant dense<0.000000e+00> : vector<8x8xf32>
    %86 = tpu.matmul %85, %73, %cst_36 {dimension_numbers = #tpu.dot_dimension_numbers<[1], [0], [0], [1], [0, 0, 1, 1], [], []>} : vector<8x8xbf16>, vector<8x8xbf16>, vector<8x8xf32> -> vector<8x8xf32>
    %87 = arith.truncf %86 : vector<8x8xf32> to vector<8x8xbf16>
    %c0_37 = arith.constant 0 : index
    %c24_38 = arith.constant 24 : index
    %88 = vector.load %arg11[%c0_37, %c24_38] : memref<8x32xbf16, #tpu.memory_space<vmem>>, vector<8x8xbf16>
    tpu.vector_store %arg11[%c0_37, %c24_38], %87 {strides = array<i32>} : memref<8x32xbf16, #tpu.memory_space<vmem>>, vector<8x8xbf16>,
    %c0_39 = arith.constant 0 : index
    %c0_40 = arith.constant 0 : index
    %89 = vector.load %arg11[%c0_39, %c0_40] : memref<8x32xbf16, #tpu.memory_space<vmem>>, vector<8x32xbf16>
    %c0_41 = arith.constant 0 : index
    %c0_42 = arith.constant 0 : index
    %90 = vector.load %arg7[%c0_41, %c0_42] : memref<32x32xbf16, #tpu.memory_space<vmem>>, vector<32x32xbf16>
    %cst_43 = arith.constant dense<0.000000e+00> : vector<8x32xf32>
    %91 = tpu.matmul %89, %90, %cst_43 {dimension_numbers = #tpu.dot_dimension_numbers<[1], [0], [0], [1], [0, 0, 1, 1], [], []>} : vector<8x32xbf16>, vector<32x32xbf16>, vector<8x32xf32> -> vector<8x32xf32>
    %c0_44 = arith.constant 0 : index
    %c0_45 = arith.constant 0 : index
    %92 = vector.load %arg8[%c0_44, %c0_45] : memref<1x32xf32, #tpu.memory_space<vmem>>, vector<1x32xf32>
    %93 = vector.shape_cast %92 : vector<1x32xf32> to vector<32xf32>
    %94 = vector.shape_cast %93 : vector<32xf32> to vector<1x32xf32>
    %95 = vector.broadcast %94 : vector<1x32xf32> to vector<8x32xf32>
    %96 = arith.addf %91, %95 : vector<8x32xf32>
    %c0_46 = arith.constant 0 : index
    %c0_47 = arith.constant 0 : index
    %c0_48 = arith.constant 0 : index
    %97 = vector.load %arg9[%c0_46, %c0_47, %c0_48] : memref<1x8x32xf32, #tpu.memory_space<vmem>>, vector<1x8x32xf32>
    %98 = vector.shape_cast %97 : vector<1x8x32xf32> to vector<8x32xf32>
    %99 = vector.shape_cast %96 : vector<8x32xf32> to vector<1x8x32xf32>
    tpu.vector_store %arg9[%c0_46, %c0_47, %c0_48], %99 {strides = array<i32>} : memref<1x8x32xf32, #tpu.memory_space<vmem>>, vector<1x8x32xf32>,
    return
  }
  func.func @transform_0(%arg0: i32, %arg1: i32) -> (i32, i32, i32) {
    %c0_i32 = arith.constant 0 : i32
    %c0_i32_0 = arith.constant 0 : i32
    %c0_i32_1 = arith.constant 0 : i32
    return %arg0, %c0_i32, %c0_i32_0 : i32, i32, i32
  }
  func.func @transform_1(%arg0: i32, %arg1: i32) -> (i32, i32) {
    %c0_i32 = arith.constant 0 : i32
    %c0_i32_0 = arith.constant 0 : i32
    %c0_i32_1 = arith.constant 0 : i32
    return %c0_i32, %c0_i32_0 : i32, i32
  }
  func.func @transform_2(%arg0: i32, %arg1: i32) -> (i32, i32) {
    %c0_i32 = arith.constant 0 : i32
    %c0_i32_0 = arith.constant 0 : i32
    %c0_i32_1 = arith.constant 0 : i32
    return %c0_i32, %c0_i32_0 : i32, i32
  }
  func.func @transform_3(%arg0: i32, %arg1: i32) -> (i32, i32) {
    %c0_i32 = arith.constant 0 : i32
    %c0_i32_0 = arith.constant 0 : i32
    %c0_i32_1 = arith.constant 0 : i32
    return %c0_i32, %c0_i32_0 : i32, i32
  }
  func.func @transform_4(%arg0: i32, %arg1: i32) -> (i32, i32) {
    %c0_i32 = arith.constant 0 : i32
    %c0_i32_0 = arith.constant 0 : i32
    %c0_i32_1 = arith.constant 0 : i32
    return %c0_i32, %c0_i32_0 : i32, i32
  }
  func.func @transform_5(%arg0: i32, %arg1: i32) -> (i32, i32) {
    %c0_i32 = arith.constant 0 : i32
    %c0_i32_0 = arith.constant 0 : i32
    %c0_i32_1 = arith.constant 0 : i32
    return %c0_i32, %c0_i32_0 : i32, i32
  }
  func.func @transform_6(%arg0: i32, %arg1: i32) -> (i32, i32) {
    %c0_i32 = arith.constant 0 : i32
    %c0_i32_0 = arith.constant 0 : i32
    %c0_i32_1 = arith.constant 0 : i32
    return %c0_i32, %c0_i32_0 : i32, i32
  }
  func.func @transform_7(%arg0: i32, %arg1: i32) -> (i32, i32, i32) {
    %c0_i32 = arith.constant 0 : i32
    %c0_i32_0 = arith.constant 0 : i32
    return %arg0, %arg1, %c0_i32 : i32, i32, i32
  }
}

</mosaic_0001>

<bundles_post_ra>
// kernel: tpu_custom_call.1
= control target key start
LH: loop header
LB: loop body
LE: loop exit
PB: predicated region body
PF: predicated region fallthrough
CT: control target
= control target key end

     0   :  { %s1548_s0 = inlined_call_operand.hbm [shape: f32[2,8,32], index: 0, kind: input, shape index: {}]   ;;  %s1549_s1 = inlined_call_operand.hbm [shape: bf16[32,32], index: 1, kind: input, shape index: {}]   ;;  %s1550_s2 = inlined_call_operand.vmem [shape: f32[1,32], index: 2, kind: input, shape index: {}]   ;;  %s1551_s3 = inlined_call_operand.hbm [shape: bf16[32,64], index: 3, kind: input, shape index: {}]   ;;  %s1552_s4 = inlined_call_operand.vmem [shape: f32[1,64], index: 4, kind: input, shape index: {}]   ;;  %s1553_s5 = inlined_call_operand.hbm [shape: bf16[32,32], index: 5, kind: input, shape index: {}]   ;;  %s1554_s6 = inlined_call_operand.vmem [shape: f32[1,32], index: 6, kind: input, shape index: {}]   ;;  %s1555_s7 = inlined_call_operand.hbm [shape: f32[2,8,32], index: 7, kind: output, shape index: {}]  }
   0x1   :  { %1556 = sst [smem:[#allocation17_spill]] %s1549_s1 }
   0x2   :  { %1557 = sst [smem:[#allocation18_spill]] %s1551_s3 }
   0x3   :  { %12 = vsyncpa [#allocation5], 0 }
   0x4   :  { %14 = vsyncpa [#allocation5 + $0x1], 0 }
   0x5   :  { %15 = vsyncpa [#allocation8], 0 }
   0x6   :  { %16 = vsyncpa [#allocation11], 0 }
   0x7   :  { %17 = vsyncpa [#allocation6], 0 }
   0x8   :  { %19 = vsyncpa [#allocation6 + $0x1], 0  ;;  %s1330_s24 = smov 0   ;;  %s1332_s25 = smov 0  }
   0x9   :  { %s1334_s26 = smov 0   ;;  %s1336_s27 = smov 0  }
   0xa   :  { %s1338_s28 = smov 0   ;;  %s1340_s29 = smov 0  }
   0xb LB: > { %s879_s30 = sadd.s32 4294967295, %s1273_s29   ;;  %p881_p0 = scmp.ge.s32.totalorder %s1273_s29, 1  ;;  %s1273_s29 = sphi %s1340_s29, %s25_s29   ;;  %s1269_s28 = sphi %s1338_s28, %s1571_s28   ;;  %s1265_s27 = sphi %s1336_s27, %s1570_s27   ;;  %s1261_s26 = sphi %s1334_s26, %s1569_s26   ;;  %s1257_s25 = sphi %s1332_s25, %s1568_s25   ;;  %s1253_s24 = sphi %s1330_s24, %s1567_s24  }
   0xc   : > { %p1364_p1 = scmp.eq.s32.totalorder %s879_s30, 0  ;;  %p222_p2 = scmp.lt.s32.totalorder %s1273_s29, 3 }
   0xd   : > { %s1559_s1 = sld [smem:[#allocation17_spill]]  ;;  %s1275_s13 = smov [#allocation7]  }
   0xe   : > { %p1372_p3 = pnand %p881_p0, %p222_p2  ;;  %s235_s14 = sshll.u32 %s1275_s13, 4  ;;  %s236_s14 = int_to_ptr.vmem [resolvable:$true] %s235_s14 }
   0xf   : > { %p885_p6 = scmp.ge.s32.totalorder %s1273_s29, 2  ;;  %s1562_s3 = sld [smem:[#allocation18_spill]] }
  0x10   : > { %p955_p4 = pneg %p1372_p3  ;;  %s1276_s19 = smov 64  }
  0x11   : > { %s1277_s20 = smov 4   ;;  %s1278_s21 = smov [#allocation9]  }
  0x12   : > { %p1380_p5 = pnand %p955_p4, %p1364_p1  ;;  %s252_s22 = sshll.u32 %s1278_s21, 4  ;;  %s253_s22 = int_to_ptr.vmem [resolvable:$true] %s252_s22 }
  0x13   : > { %s233_s11 = sshll.u32 %s1559_s1, 4  ;;  %s267_s10 = sshll.u32 %s1553_s5, 4  ;;  %s234_s11 = int_to_ptr.hbm [resolvable:$true] %s233_s11  ;;  %s268_s10 = int_to_ptr.hbm [resolvable:$true] %s267_s10 }
  0x14   : > { %958 = dma.hbm_to_vmem [thread:$0]  (!%p1380_p5), %s234_s11, 256, %s236_s14, [#allocation8], %s1276_s19, %s1276_s19, %s1277_s20  }
  0x15   : > { %s250_s18 = sshll.u32 %s1562_s3, 4  ;;  %s1279_s13 = smov [#allocation10]   ;;  %s251_s18 = int_to_ptr.hbm [resolvable:$true] %s250_s18 }
  0x16   : > { %961 = dma.hbm_to_vmem [thread:$0]  (!%p1380_p5), %s251_s18, 256, %s253_s22, [#allocation8], %s1276_s19, %s1276_s19, %s1277_s20  }
  0x17   : > { %s269_s16 = sshll.u32 %s1279_s13, 4  ;;  %s880_s11 = sadd.s32 4294967294, %s1273_s29   ;;  %s270_s16 = int_to_ptr.vmem [resolvable:$true] %s269_s16 }
  0x18   : > { %964 = dma.hbm_to_vmem [thread:$0]  (!%p1380_p5), %s268_s10, 256, %s270_s16, [#allocation11], %s1276_s19, %s1276_s19, %s1277_s20  }
  0x19   : > { %s37_s14 = sadd.s32 1, %s1269_s28  ;;  %s44_s17 = sadd.s32 1, %s1261_s26 }
  0x1a   : > { %p39_p7 = scmp.ge.s32.totalorder %s37_s14, 2  ;;  %p51_p8 = scmp.ne.s32.totalorder %s1261_s26, %s1257_s25 }
  0x1b   : > { %p52_p9 = scmp.eq.s32.totalorder %s1273_s29, 0  ;;  %p57_p10 = scmp.ne.s32.totalorder %s1257_s25, %s1253_s24 }
  0x1c   : > { %s1573_s14 = smov (%p39_p7, %s37_s14), 0  ;;  %p209_p13 = scmp.eq.s32.totalorder %s879_s30, 1 }
  0x1d   : > { %p1407_p11 = por %p52_p9, %p51_p8  ;;  %p1413_p12 = por %p1364_p1, %p57_p10 }
  0x1e   : > { %s41_s19 = ssub.s32 %s1269_s28, %s1573_s14  ;;  %p215_p2 = scmp.eq.s32.totalorder %s880_s11, 1 }
  0x1f   : > { %p42_p0 = scmp.eq.s32.totalorder %s41_s19, 0  ;;  %p1421_p4 = por %p209_p13, %p51_p8 }
  0x20   : > { %p976_p5 = scmp.lt.s32.totalorder %s1273_s29, 2  ;;  %p1429_p7 = por %p215_p2, %p57_p10 }
  0x21   : > { %s1427_s21 = scalar_select %p42_p0, %s1261_s26, %s44_s17  }
  0x22   : > { %s286_s23 = sand.u32 1, %s1261_s26   ;;  %s887_s10 = sshll.u32 %s1269_s28, 3 }
  0x23   : > { %s886_s9 = sshll.u32 %s286_s23, 3  ;;  %s294_s30 = scalar_lea.hbm %s1548_s0, %s887_s10 }
  0x24   : > { %s290_s19 = scalar_lea.vmem [#allocation4], %s886_s9  ;;  %s296_s1 = sshll.u32 %s294_s30, 4  ;;  %s297_s1 = int_to_ptr.hbm [resolvable:$true] %s296_s1 }
  0x25   : > { %s298_s11 = sshll.u32 %s290_s19, 4  ;;  %p966_p8 = pnand %p976_p5, %p1407_p11  ;;  %s299_s11 = int_to_ptr.vmem [resolvable:$true] %s298_s11 }
  0x26   : > { %s287_s17 = scalar_lea.sflag [#allocation5], %s286_s23  ;;  %307 = sbr.rel (%p1372_p3) target bundleno = 1388 (0x56c), region = 48 }
  0x27   : > { %968 = dma.hbm_to_vmem [thread:$0]  (!%p966_p8), %s297_s1, 128, %s299_s11, %s287_s17  }
  0x28   : > { %s1443_s3 = sand.u32 (!%p1372_p3), 1, %s1257_s25  }
  0x29   : > { %s889_s10 = sshll.u32 (!%p1372_p3), %s1443_s3, 3  ;;  %s310_s9 = scalar_lea.sflag (!%p1372_p3), [#allocation5], %s1443_s3 }
  0x2a   : > { %s313_s13 = scalar_lea.vmem (!%p1372_p3), [#allocation4], %s889_s10 }
  0x2b   : > { %1236 = dma.done.wait (%p1413_p12), %s310_s9, 128  }
  0x2c   : > { %1238 = vsyncadd (%p1413_p12), %s310_s9, 4294967168 }
  0x2d   : > { %1240 = dma.done.wait (%p1364_p1), [#allocation8], 512  }
  0x2e   : > { %1242 = vsyncadd (%p1364_p1), [#allocation8], 4294966784 }
  0x2f   : > { %1244 = dma.done.wait (%p1364_p1), [#allocation11], 256  }
  0x30   : > { %1246 = vsyncadd (%p1364_p1), [#allocation11], 4294967040  ;;  %v934_v0 = vld [vmem:[#allocation9 + $0x8] sm:$0xff]  ;;  %v936_v1 = vld [vmem:[#allocation7 + $0x8] sm:$0xff]  ;;  %vm387_vm0 = vcmask 261120   ;;  %vm405_vm1 = vcmask 519168  }
  0x31   : > { %v933_v2 = vld [vmem:[#allocation9] sm:$0xff]  ;;  %v935_v3 = vld [vmem:[#allocation7] sm:$0xff]  ;;  %397 = vmatpush.bf16.msra.mxu0 %v934_v0  ;;  %441 = vmatpush.bf16.msra.mxu1 %v936_v1  ;;  %v1044_v6 = vld [vmem:[%s1552_s4] ss:$0 sm:$0xff]  ;;  %s1280_s15 = smov 120   ;;  %vm450_vm2 = vcmask 64512  }
  0x32   : > { %v370_v4 = vld [vmem:[%s313_s13] sm:$0xff]  ;;  %v1045_v7 = vld [vmem:[%s1550_s2] ss:$0 sm:$0xff]  ;;  %s1281_s23 = smov 112   ;;  %s1282_s16 = smov 96   ;;  %vm490_vm3 = vcmask 1043456  }
  0x33   : > { %v371_v5 = vpack.c.bf16 %v370_v4, %v370_v4  ;;  %s1283_s30 = smov 104   ;;  %vm508_vm4 = vcmask 60416   ;;  %s1284_s19 = smov 88   ;;  %vm578_vm5 = vcmask 126016   ;;  %vm645_vm6 = vcmask 191616  }
  0x34   : > { %s1285_s11 = smov 80   ;;  %s1286_s17 = smov 72   ;;  %vm712_vm7 = vcmask 257216  }
  0x35   : > { %398 = vmatpush.bf16.msra.mxu0 %v933_v2  ;;  %442 = vmatpush.bf16.msra.mxu1 %v935_v3  ;;  %s1287_s9 = smov 8   ;;  %s1288_s13 = smov 16  }
  0x36   : > { %s1289_s1 = smov 24   ;;  %s930_s12 = sshll.u32 %s1265_s27, 3 }
  0x37   : > { %s753_s27 = scalar_lea.sflag [#allocation6], %s1443_s3 }
  0x38   : > { %902 = vmatmul.msk.bf16.vlgmr.msra.gmra.mxu0 %vm387_vm0, %v371_v5  ;;  %911 = vmatmul.msk.bf16.vlgmr.msra.gmra.mxu1 %vm387_vm0, %v371_v5 }
  0xb5   : > { %v400_v8 = vpop.f32.mrf.mxu0  ;;  %v444_v9 = vpop.f32.mrf.mxu1 }
  0xb6   : > { %v401_v10 = vadd.f32 %v1044_v6, %v400_v8  ;;  %v445_v11 = vadd.f32 %v1045_v7, %v444_v9 }
  0xb8   : > { %v404_v12 = vpack.c.bf16 %v401_v10, %v401_v10  ;;  %v448_v13 = vpack.c.bf16 %v445_v11, %v445_v11 }
  0xba   : > { %406 = vst.msk [vmem:[#allocation2] sm:$0xf] %vm405_vm1, %v404_v12  ;;  %v512_v14 = vunpack.c.l.b16 %v448_v13 }
  0xbc   : > { %v513_v15 = vpack.c.b16 %v512_v14, %v512_v14 }
  0xbd   : > { %v402_v16 = vpop.f32.mrf.mxu0  ;;  %v446_v17 = vpop.f32.mrf.mxu1 }
  0xbe   : > { %514 = vrot.lane.b32.xlu2 %v513_v15, %s1280_s15 }
  0xc1   : > { %v449_v18 = vld [vmem:[#allocation2] sm:$0xf] }
  0xc2   : > { %v580_v19 = vld [vmem:[#allocation2] sm:$0xf]  ;;  %v455_v20 = vsel %vm450_vm2, %v449_v18, 0  ;;  %v483_v21 = vunpack.c.l.b16 %v449_v18 }
  0xc3   : > { %v584_v22 = vunpack.c.l.b16 %v580_v19  ;;  %464 = vmatpush.bf16.xpose.msra.mxu2 %v455_v20  ;;  %v510_v25 = vld [vmem:[#allocation2] sm:$0xf] }
  0xc4   : > { %v484_v24 = vpack.c.b16 %v483_v21, %v483_v21  ;;  %v517_v26 = vunpack.c.l.b16 %v510_v25  ;;  %v647_v47 = vld [vmem:[#allocation2] sm:$0xf] }
  0xc5   : > { %v1470_v23 = vpack.c.b16 %v584_v22, %v584_v22  ;;  %v651_v48 = vunpack.c.l.b16 %v647_v47 }
  0xc6   : > { %485 = vrot.lane.b32.xlu1 %v484_v24, %s1282_s16  ;;  %v1474_v27 = vpack.c.b16 %v517_v26, %v517_v26 }
  0xc7   : > { %586 = vrot.lane.b32.xlu2 %v1470_v23, %s1281_s23  ;;  %v652_v49 = vpack.c.b16 %v651_v48, %v651_v48 }
  0xca   : > { %912 = vmatmul.msk.bf16.vlgmr.msra.gmra.mxu2 %vm450_vm2, %v448_v13 }
  0xce   : > { %519 = vrot.lane.b32.xlu1 %v1474_v27, %s1280_s15  ;;  %s764_s15 = scalar_lea.hbm %s1555_s7, %s930_s12 }
  0xcf   : > { %648 = vrot.lane.b32.xlu2 %v513_v15, %s1283_s30 }
  0xd6   : > { %581 = vrot.lane.b32.xlu1 %v513_v15, %s1281_s23 }
 0x118   : > { %v515_v28 = vpop.permute.xlu2 %514 }
 0x121   : > { %v587_v29 = vpop.permute.xlu2 %586 }
 0x122   : > { %v592_v30 = vsel %vm450_vm2, %v587_v29, 0 }
 0x123   : > { %601 = vmatpush.bf16.xpose.msrb.mxu1 %v592_v30 }
 0x129   : > { %v649_v50 = vpop.permute.xlu2 %648 }
 0x138   : > { %v486_v31 = vpop.permute.xlu1 %485 }
 0x139   : > { %v492_v32 = vsel %vm490_vm3, %v486_v31, 0 }
 0x13a   : > { %501 = vmatpush.bf16.msra.mxu3 %v492_v32 }
 0x140   : > { %v520_v33 = vpop.permute.xlu1 %519 }
 0x141   : > { %v525_v34 = vsel %vm450_vm2, %v520_v33, 0 }
 0x142   : > { %534 = vmatpush.bf16.xpose.msrb.mxu3 %v525_v34 }
 0x148   : > { %v582_v35 = vpop.permute.xlu1 %581 }
 0x149   : > { %916 = vmatmul.msk.bf16.vlgmr.msrb.gmra.mxu1 %vm450_vm2, %v582_v35 }
 0x14d   : > { %v466_v36 = vpop.f32.mrf.mxu2 }
 0x14e   : > { %v470_v37 = vsel %vm450_vm2, %v466_v36, -inf }
 0x14f   : > { %471 = vmax.xlane.f32.xlu0 %v470_v37 }
 0x155   : > { %v468_v38 = vpop.f32.mrf.mxu2 }
 0x1c2   : > { %v472_v39 = vpop.xlane.xlu0 %471 }
 0x1c3   : > { %v473_v40 = vsub.f32 %v466_v36, %v472_v39 }
 0x1c5   : > { %v474_v41 = vmul.f32 1.442695, %v473_v40 }
 0x1c6   : > { %v603_v42 = vpop.f32.mrf.mxu1 }
 0x1c7   : > { %1047 = vpow2.f32 %v474_v41  ;;  %v607_v43 = vsel %vm450_vm2, %v603_v42, -inf }
 0x1c8   : > { %608 = vmax.xlane.f32.xlu2 %v607_v43 }
 0x1cd   : > { %v1048_v44 = vpop.eup %1047 }
 0x1ce   : > { %v605_v45 = vpop.f32.mrf.mxu1  ;;  %v476_v46 = vsel %vm450_vm2, %v1048_v44, 0.0 }
 0x1cf   : > { %477 = vadd.xlane.f32.xlu0 %v476_v46  ;;  %v937_v45 = vld [vmem:[#allocation10] sm:$0xff] }
 0x1e3   : > { %653 = vrot.lane.b32.xlu0 %v652_v49, %s1283_s30  ;;  %s359_s30 = scalar_lea.vmem [#allocation12], %s889_s10  ;;  %s1203_s10 = scalar_lea.hbm %s1555_s7, 16 }
 0x23b   : > { %v609_v51 = vpop.xlane.xlu2 %608 }
 0x23c   : > { %v610_v52 = vsub.f32 %v603_v42, %v609_v51 }
 0x23e   : > { %v611_v53 = vmul.f32 1.442695, %v610_v52 }
 0x240   : > { %1049 = vpow2.f32 %v611_v53 }
 0x242   : > { %v478_v54 = vpop.xlane.xlu0 %477 }
 0x243   : > { %1051 = vrcp.f32 %v478_v54 }
 0x246   : > { %v1050_v55 = vpop.eup %1049 }
 0x247   : > { %v613_v56 = vsel %vm450_vm2, %v1050_v55, 0.0 }
 0x248   : > { %614 = vadd.xlane.f32.xlu2 %v613_v56 }
 0x249   : > { %v1052_v57 = vpop.eup %1051 }
 0x24a   : > { %v480_v58 = vmul.f32 %v1052_v57, %v1048_v44  ;;  %v938_v44 = vld [vmem:[#allocation10 + $0x8] sm:$0xff] }
 0x24b   : > { %744 = vmatpush.bf16.msra.mxu1 %v938_v44 }
 0x24c   : > { %v481_v59 = vpack.c.bf16 %v480_v58, %v480_v58 }
 0x24e   : > { %913 = vmatmul.msk.bf16.vlgmr.msra.gmra.mxu3 %vm450_vm2, %v481_v59 }
 0x24f   : > { %745 = vmatpush.bf16.msra.mxu1 %v937_v45 }
 0x255   : > { %v654_v60 = vpop.permute.xlu0 %653 }
 0x256   : > { %v659_v61 = vsel %vm450_vm2, %v654_v60, 0 }
 0x257   : > { %668 = vmatpush.bf16.xpose.msra.mxu3 %v659_v61 }
 0x25e   : > { %914 = vmatmul.msk.bf16.vlgmr.msrb.gmra.mxu3 %vm450_vm2, %v515_v28 }
 0x26e   : > { %918 = vmatmul.msk.bf16.vlgmr.msra.gmra.mxu3 %vm450_vm2, %v649_v50  ;;  %v1046_v50 = vld [vmem:[%s1554_s6] ss:$0 sm:$0xff] }
 0x2bb   : > { %v615_v19 = vpop.xlane.xlu2 %614 }
 0x2d1   : > { %v503_v62 = vpop.f32.mrf.mxu3 }
 0x2d2   : > { %v507_v63 = vpack.c.bf16 %v503_v62, %v503_v62 }
 0x2d4   : > { %509 = vst.msk [vmem:[#allocation3] sm:$0xf] %vm508_vm4, %v507_v63 }
 0x2d9   : > { %v505_v0 = vpop.f32.mrf.mxu3 }
 0x2e1   : > { %v536_v1 = vpop.f32.mrf.mxu3 }
 0x2e2   : > { %v540_v2 = vsel %vm450_vm2, %v536_v1, -inf }
 0x2e3   : > { %541 = vmax.xlane.f32.xlu1 %v540_v2 }
 0x2e9   : > { %v538_v3 = vpop.f32.mrf.mxu3 }
 0x2f1   : > { %v670_v4 = vpop.f32.mrf.mxu3 }
 0x2f2   : > { %v674_v5 = vsel %vm450_vm2, %v670_v4, -inf }
 0x2f3   : > { %675 = vmax.xlane.f32.xlu0 %v674_v5 }
 0x2f9   : > { %v672_v6 = vpop.f32.mrf.mxu3 }
 0x2fc   : > { %552 = vrot.lane.b32.xlu1 %v1474_v27, %s1284_s19  ;;  %s766_s19 = sshll.u32 %s359_s30, 4  ;;  %s767_s19 = int_to_ptr.vmem [resolvable:$true] %s766_s19 }
 0x356   : > { %v542_v7 = vpop.xlane.xlu1 %541 }
 0x357   : > { %v543_v8 = vsub.f32 %v536_v1, %v542_v7 }
 0x359   : > { %v544_v9 = vmul.f32 1.442695, %v543_v8 }
 0x35b   : > { %1053 = vpow2.f32 %v544_v9 }
 0x361   : > { %v1054_v10 = vpop.eup %1053 }
 0x362   : > { %v546_v11 = vsel %vm450_vm2, %v1054_v10, 0.0 }
 0x363   : > { %547 = vadd.xlane.f32.xlu2 %v546_v11 }
 0x366   : > { %v676_v12 = vpop.xlane.xlu0 %675 }
 0x367   : > { %v677_v13 = vsub.f32 %v670_v4, %v676_v12 }
 0x369   : > { %v678_v14 = vmul.f32 1.442695, %v677_v13 }
 0x36b   : > { %1055 = vpow2.f32 %v678_v14 }
 0x36c   : > { %1057 = vrcp.f32 %v615_v19 }
 0x36e   : > { %v553_v15 = vpop.permute.xlu1 %552 }
 0x36f   : > { %v558_v16 = vsel %vm490_vm3, %v553_v15, 0 }
 0x370   : > { %567 = vmatpush.bf16.msrb.mxu0 %v558_v16 }
 0x371   : > { %v1056_v17 = vpop.eup %1055 }
 0x372   : > { %v680_v18 = vsel %vm450_vm2, %v1056_v17, 0.0  ;;  %v1058_v21 = vpop.eup %1057 }
 0x373   : > { %681 = vadd.xlane.f32.xlu0 %v680_v18  ;;  %v617_v24 = vmul.f32 %v1058_v21, %v1050_v55 }
 0x375   : > { %v618_v29 = vpack.c.bf16 %v617_v24, %v617_v24 }
 0x37b   : > { %619 = vrot.lane.b32.xlu2 %v1470_v23, %s1285_s11  ;;  %s768_s11 = sshll.u32 %s764_s15, 4  ;;  %s769_s11 = int_to_ptr.hbm [resolvable:$true] %s768_s11 }
 0x387   : > { %686 = vrot.lane.b32.xlu0 %v652_v49, %s1286_s17  ;;  %s1197_s17 = sshra.s32 %s769_s11, 4  ;;  %s1198_s17 = int_to_ptr.hbm [resolvable:$true] %s1197_s17 }
 0x388   : > { %p1204_p10 = scmp.lt.s32.totalorder %s1198_s17, %s1555_s7 }
 0x3d6   : > { %v548_v20 = vpop.xlane.xlu2 %547 }
 0x3d7   : > { %1059 = vrcp.f32 %v548_v20 }
 0x3dd   : > { %v1060_v22 = vpop.eup %1059 }
 0x3de   : > { %v550_v25 = vmul.f32 %v1060_v22, %v1054_v10  ;;  %v620_v26 = vpop.permute.xlu2 %619 }
 0x3df   : > { %v625_v27 = vsel %vm490_vm3, %v620_v26, 0 }
 0x3e0   : > { %634 = vmatpush.bf16.msrb.mxu2 %v625_v27  ;;  %v551_v28 = vpack.c.bf16 %v550_v25, %v550_v25 }
 0x3e2   : > { %915 = vmatmul.msk.bf16.vlgmr.msrb.gmra.mxu0 %vm450_vm2, %v551_v28 }
 0x3e3   : > { %917 = vmatmul.msk.bf16.vlgmr.msrb.gmra.mxu2 %vm450_vm2, %v618_v29 }
 0x3e6   : > { %v682_v23 = vpop.xlane.xlu0 %681 }
 0x3e7   : > { %1061 = vrcp.f32 %v682_v23 }
 0x3ed   : > { %v1062_v30 = vpop.eup %1061 }
 0x3ee   : > { %v684_v31 = vmul.f32 %v1062_v30, %v1056_v17 }
 0x3f0   : > { %v685_v34 = vpack.c.bf16 %v684_v31, %v684_v31 }
 0x3f9   : > { %v687_v32 = vpop.permute.xlu0 %686 }
 0x3fa   : > { %v692_v33 = vsel %vm490_vm3, %v687_v32, 0 }
 0x3fb   : > { %701 = vmatpush.bf16.msra.mxu0 %v692_v33 }
 0x3fe   : > { %919 = vmatmul.msk.bf16.vlgmr.msra.gmra.mxu0 %vm450_vm2, %v685_v34 }
 0x45f   : > { %v569_v35 = vpop.f32.mrf.mxu0 }
 0x460   : > { %v573_v36 = vpack.c.bf16 %v569_v35, %v569_v35 }
 0x462   : > { %575 = vrot.lane.b32.xlu1 %v573_v36, %s1287_s9  ;;  %s1199_s9 = scalar_lea.hbm %s1198_s17, 8 }
 0x463   : > { %p1200_p1 = scmp.ne.s32.totalorder %s1198_s17, %s1199_s9  ;;  %p1205_p11 = scmp.lt.s32.totalorder %s1203_s10, %s1199_s9 }
 0x465   : > { %p1201_p3 = pnand %p1200_p1, %p1421_p4  ;;  %p1206_p12 = por %p1205_p11, %p1204_p10 }
 0x466   : > { %v636_v37 = vpop.f32.mrf.mxu2 }
 0x467   : > { %v640_v38 = vpack.c.bf16 %v636_v37, %v636_v37  ;;  %v571_v39 = vpop.f32.mrf.mxu0  ;;  %p1202_p9 = pneg %p1201_p3 }
 0x469   : > { %p1207_p13 = pnand %p1206_p12, %p1202_p9 }
 0x46a   : > { %642 = vrot.lane.b32.xlu1 %v640_v38, %s1288_s13 }
 0x46e   : > { %v638_v40 = vpop.f32.mrf.mxu2 }
 0x47b   : > { %v703_v41 = vpop.f32.mrf.mxu0 }
 0x47c   : > { %v707_v42 = vpack.c.bf16 %v703_v41, %v703_v41 }
 0x47e   : > { %709 = vrot.lane.b32.xlu2 %v707_v42, %s1289_s1 }
 0x483   : > { %v705_v43 = vpop.f32.mrf.mxu0 }
 0x4d4   : > { %v576_v46 = vpop.permute.xlu1 %575 }
 0x4d5   : > { %579 = vst.msk [vmem:[#allocation3] sm:$0xf] %vm578_vm5, %v576_v46 }
 0x4d8   : > { %v710_v48 = vpop.permute.xlu2 %709 }
 0x4dc   : > { %v643_v47 = vpop.permute.xlu1 %642 }
 0x4dd   : > { %646 = vst.msk [vmem:[#allocation3] sm:$0xf] %vm645_vm6, %v643_v47 }
 0x4de   : > { %713 = vst.msk [vmem:[#allocation3] sm:$0xf] %vm712_vm7, %v710_v48 }
 0x4e5   : > { %v714_v49 = vld [vmem:[#allocation3] sm:$0xf] }
 0x4e6   : > { %928 = vmatmul.msk.bf16.vlgmr.msra.gmra.mxu1 %vm387_vm0, %v714_v49 }
 0x563   : > { %v747_v51 = vpop.f32.mrf.mxu1 }
 0x564   : > { %v748_v52 = vadd.f32 %v1046_v50, %v747_v51 }
 0x566   : > { %751 = vst.msk [vmem:[%s359_s30] sm:$0xff] %vm387_vm0, %v748_v52 }
 0x567   : > { %1210 = shalt.err (!%p1207_p13)
}
 0x568   : > { %953 = dma.vmem_to_hbm [thread:$0]  (%p1421_p4), %s767_s19, 128, %s769_s11, %s753_s27  }
 0x56b   : > { %v749_v53 = vpop.f32.mrf.mxu1 }
 0x56c PF: > { %s780_s3 = sand.u32 1, %s1253_s24   ;;  %p970_p0 = pnand %p885_p6, %p1429_p7 }
 0x56d   : > { %s781_s18 = scalar_lea.sflag [#allocation6], %s780_s3 }
 0x56e   : > { %p971_p2 = pneg %p970_p0 }
 0x570   : > { %1248 = dma.done.wait (%p971_p2), %s781_s18, 128  }
 0x571   : > { %1250 = vsyncadd (%p971_p2), %s781_s18, 4294967168  ;;  %s25_s29 = sadd.s32 1, %s1273_s29   ;;  %s1567_s24 = smov %s1257_s25 }
 0x572   : > { %p22_p5 = scmp.ge.s32.totalorder %s25_s29, 4   ;;  %s1568_s25 = smov %s1261_s26 }
 0x573   : > { %s1569_s26 = smov %s1427_s21  ;;  %s1570_s27 = smov %s1269_s28 }
 0x574   : > { %s1571_s28 = smov %s1573_s14  ;;  %24 = sbr.rel (!%p22_p5) target bundleno = 11 (0xb), region = 110 }
 0x579   :  { %787 = vsyncpa [#allocation5], 1 }
 0x57a   :  { %789 = vsyncpa [#allocation5 + $0x1], 1 }
 0x57b   :  { %790 = vsyncpa [#allocation8], 1 }
 0x57c   :  { %791 = vsyncpa [#allocation11], 1 }
 0x57d   :  { %792 = vsyncpa [#allocation6], 1 }
 0x57e   :  { %794 = vsyncpa [#allocation6 + $0x1], 1 }

// kernel: tpu_custom_call.1
= control target key start
LH: loop header
LB: loop body
LE: loop exit
PB: predicated region body
PF: predicated region fallthrough
CT: control target
= control target key end

     0   :  { %s1548_s0 = inlined_call_operand.hbm [shape: f32[2,8,32], index: 0, kind: input, shape index: {}]   ;;  %s1549_s1 = inlined_call_operand.hbm [shape: bf16[32,32], index: 1, kind: input, shape index: {}]   ;;  %s1550_s2 = inlined_call_operand.vmem [shape: f32[1,32], index: 2, kind: input, shape index: {}]   ;;  %s1551_s3 = inlined_call_operand.hbm [shape: bf16[32,64], index: 3, kind: input, shape index: {}]   ;;  %s1552_s4 = inlined_call_operand.vmem [shape: f32[1,64], index: 4, kind: input, shape index: {}]   ;;  %s1553_s5 = inlined_call_operand.hbm [shape: bf16[32,32], index: 5, kind: input, shape index: {}]   ;;  %s1554_s6 = inlined_call_operand.vmem [shape: f32[1,32], index: 6, kind: input, shape index: {}]   ;;  %s1555_s7 = inlined_call_operand.hbm [shape: f32[2,8,32], index: 7, kind: output, shape index: {}]  }
   0x1   :  { %1556 = sst [smem:[#allocation17_spill]] %s1549_s1 }
   0x2   :  { %1557 = sst [smem:[#allocation18_spill]] %s1551_s3 }
   0x3   :  { %12 = vsyncpa [#allocation5], 0 }
   0x4   :  { %14 = vsyncpa [#allocation5 + $0x1], 0 }
   0x5   :  { %15 = vsyncpa [#allocation8], 0 }
   0x6   :  { %16 = vsyncpa [#allocation11], 0 }
   0x7   :  { %17 = vsyncpa [#allocation6], 0 }
   0x8   :  { %19 = vsyncpa [#allocation6 + $0x1], 0  ;;  %s1330_s24 = smov 0   ;;  %s1332_s25 = smov 0  }
   0x9   :  { %s1334_s26 = smov 0   ;;  %s1336_s27 = smov 0  }
   0xa   :  { %s1338_s28 = smov 0   ;;  %s1340_s29 = smov 0  }
   0xb LB: > { %s879_s30 = sadd.s32 4294967295, %s1273_s29   ;;  %p881_p0 = scmp.ge.s32.totalorder %s1273_s29, 1  ;;  %s1273_s29 = sphi %s1340_s29, %s25_s29   ;;  %s1269_s28 = sphi %s1338_s28, %s1571_s28   ;;  %s1265_s27 = sphi %s1336_s27, %s1570_s27   ;;  %s1261_s26 = sphi %s1334_s26, %s1569_s26   ;;  %s1257_s25 = sphi %s1332_s25, %s1568_s25   ;;  %s1253_s24 = sphi %s1330_s24, %s1567_s24  }
   0xc   : > { %p1364_p1 = scmp.eq.s32.totalorder %s879_s30, 0  ;;  %p222_p2 = scmp.lt.s32.totalorder %s1273_s29, 3 }
   0xd   : > { %s1559_s1 = sld [smem:[#allocation17_spill]]  ;;  %s1275_s13 = smov [#allocation7]  }
   0xe   : > { %p1372_p3 = pnand %p881_p0, %p222_p2  ;;  %s235_s14 = sshll.u32 %s1275_s13, 4  ;;  %s236_s14 = int_to_ptr.vmem [resolvable:$true] %s235_s14 }
   0xf   : > { %p885_p6 = scmp.ge.s32.totalorder %s1273_s29, 2  ;;  %s1562_s3 = sld [smem:[#allocation18_spill]] }
  0x10   : > { %p955_p4 = pneg %p1372_p3  ;;  %s1276_s19 = smov 64  }
  0x11   : > { %s1277_s20 = smov 4   ;;  %s1278_s21 = smov [#allocation9]  }
  0x12   : > { %p1380_p5 = pnand %p955_p4, %p1364_p1  ;;  %s252_s22 = sshll.u32 %s1278_s21, 4  ;;  %s253_s22 = int_to_ptr.vmem [resolvable:$true] %s252_s22 }
  0x13   : > { %s233_s11 = sshll.u32 %s1559_s1, 4  ;;  %s267_s10 = sshll.u32 %s1553_s5, 4  ;;  %s234_s11 = int_to_ptr.hbm [resolvable:$true] %s233_s11  ;;  %s268_s10 = int_to_ptr.hbm [resolvable:$true] %s267_s10 }
  0x14   : > { %958 = dma.hbm_to_vmem [thread:$0]  (!%p1380_p5), %s234_s11, 256, %s236_s14, [#allocation8], %s1276_s19, %s1276_s19, %s1277_s20  }
  0x15   : > { %s250_s18 = sshll.u32 %s1562_s3, 4  ;;  %s1279_s13 = smov [#allocation10]   ;;  %s251_s18 = int_to_ptr.hbm [resolvable:$true] %s250_s18 }
  0x16   : > { %961 = dma.hbm_to_vmem [thread:$0]  (!%p1380_p5), %s251_s18, 256, %s253_s22, [#allocation8], %s1276_s19, %s1276_s19, %s1277_s20  }
  0x17   : > { %s269_s16 = sshll.u32 %s1279_s13, 4  ;;  %s880_s11 = sadd.s32 4294967294, %s1273_s29   ;;  %s270_s16 = int_to_ptr.vmem [resolvable:$true] %s269_s16 }
  0x18   : > { %964 = dma.hbm_to_vmem [thread:$0]  (!%p1380_p5), %s268_s10, 256, %s270_s16, [#allocation11], %s1276_s19, %s1276_s19, %s1277_s20  }
  0x19   : > { %s37_s14 = sadd.s32 1, %s1269_s28  ;;  %s44_s17 = sadd.s32 1, %s1261_s26 }
  0x1a   : > { %p39_p7 = scmp.ge.s32.totalorder %s37_s14, 2  ;;  %p51_p8 = scmp.ne.s32.totalorder %s1261_s26, %s1257_s25 }
  0x1b   : > { %p52_p9 = scmp.eq.s32.totalorder %s1273_s29, 0  ;;  %p57_p10 = scmp.ne.s32.totalorder %s1257_s25, %s1253_s24 }
  0x1c   : > { %s1573_s14 = smov (%p39_p7, %s37_s14), 0  ;;  %p209_p13 = scmp.eq.s32.totalorder %s879_s30, 1 }
  0x1d   : > { %p1407_p11 = por %p52_p9, %p51_p8  ;;  %p1413_p12 = por %p1364_p1, %p57_p10 }
  0x1e   : > { %s41_s19 = ssub.s32 %s1269_s28, %s1573_s14  ;;  %p215_p2 = scmp.eq.s32.totalorder %s880_s11, 1 }
  0x1f   : > { %p42_p0 = scmp.eq.s32.totalorder %s41_s19, 0  ;;  %p1421_p4 = por %p209_p13, %p51_p8 }
  0x20   : > { %p976_p5 = scmp.lt.s32.totalorder %s1273_s29, 2  ;;  %p1429_p7 = por %p215_p2, %p57_p10 }
  0x21   : > { %s1427_s21 = scalar_select %p42_p0, %s1261_s26, %s44_s17  }
  0x22   : > { %s286_s23 = sand.u32 1, %s1261_s26   ;;  %s887_s10 = sshll.u32 %s1269_s28, 3 }
  0x23   : > { %s886_s9 = sshll.u32 %s286_s23, 3  ;;  %s294_s30 = scalar_lea.hbm %s1548_s0, %s887_s10 }
  0x24   : > { %s290_s19 = scalar_lea.vmem [#allocation4], %s886_s9  ;;  %s296_s1 = sshll.u32 %s294_s30, 4  ;;  %s297_s1 = int_to_ptr.hbm [resolvable:$true] %s296_s1 }
  0x25   : > { %s298_s11 = sshll.u32 %s290_s19, 4  ;;  %p966_p8 = pnand %p976_p5, %p1407_p11  ;;  %s299_s11 = int_to_ptr.vmem [resolvable:$true] %s298_s11 }
  0x26   : > { %s287_s17 = scalar_lea.sflag [#allocation5], %s286_s23  ;;  %307 = sbr.rel (%p1372_p3) target bundleno = 1388 (0x56c), region = 48 }
  0x27   : > { %968 = dma.hbm_to_vmem [thread:$0]  (!%p966_p8), %s297_s1, 128, %s299_s11, %s287_s17  }
  0x28   : > { %s1443_s3 = sand.u32 (!%p1372_p3), 1, %s1257_s25  }
  0x29   : > { %s889_s10 = sshll.u32 (!%p1372_p3), %s1443_s3, 3  ;;  %s310_s9 = scalar_lea.sflag (!%p1372_p3), [#allocation5], %s1443_s3 }
  0x2a   : > { %s313_s13 = scalar_lea.vmem (!%p1372_p3), [#allocation4], %s889_s10 }
  0x2b   : > { %1236 = dma.done.wait (%p1413_p12), %s310_s9, 128  }
  0x2c   : > { %1238 = vsyncadd (%p1413_p12), %s310_s9, 4294967168 }
  0x2d   : > { %1240 = dma.done.wait (%p1364_p1), [#allocation8], 512  }
  0x2e   : > { %1242 = vsyncadd (%p1364_p1), [#allocation8], 4294966784 }
  0x2f   : > { %1244 = dma.done.wait (%p1364_p1), [#allocation11], 256  }
  0x30   : > { %1246 = vsyncadd (%p1364_p1), [#allocation11], 4294967040  ;;  %v934_v0 = vld [vmem:[#allocation9 + $0x8] sm:$0xff]  ;;  %v936_v1 = vld [vmem:[#allocation7 + $0x8] sm:$0xff]  ;;  %vm387_vm0 = vcmask 261120   ;;  %vm405_vm1 = vcmask 519168  }
  0x31   : > { %v933_v2 = vld [vmem:[#allocation9] sm:$0xff]  ;;  %v935_v3 = vld [vmem:[#allocation7] sm:$0xff]  ;;  %397 = vmatpush.bf16.msra.mxu0 %v934_v0  ;;  %441 = vmatpush.bf16.msra.mxu1 %v936_v1  ;;  %v1044_v6 = vld [vmem:[%s1552_s4] ss:$0 sm:$0xff]  ;;  %s1280_s15 = smov 120   ;;  %vm450_vm2 = vcmask 64512  }
  0x32   : > { %v370_v4 = vld [vmem:[%s313_s13] sm:$0xff]  ;;  %v1045_v7 = vld [vmem:[%s1550_s2] ss:$0 sm:$0xff]  ;;  %s1281_s23 = smov 112   ;;  %s1282_s16 = smov 96   ;;  %vm490_vm3 = vcmask 1043456  }
  0x33   : > { %v371_v5 = vpack.c.bf16 %v370_v4, %v370_v4  ;;  %s1283_s30 = smov 104   ;;  %vm508_vm4 = vcmask 60416   ;;  %s1284_s19 = smov 88   ;;  %vm578_vm5 = vcmask 126016   ;;  %vm645_vm6 = vcmask 191616  }
  0x34   : > { %s1285_s11 = smov 80   ;;  %s1286_s17 = smov 72   ;;  %vm712_vm7 = vcmask 257216  }
  0x35   : > { %398 = vmatpush.bf16.msra.mxu0 %v933_v2  ;;  %442 = vmatpush.bf16.msra.mxu1 %v935_v3  ;;  %s1287_s9 = smov 8   ;;  %s1288_s13 = smov 16  }
  0x36   : > { %s1289_s1 = smov 24   ;;  %s930_s12 = sshll.u32 %s1265_s27, 3 }
  0x37   : > { %s753_s27 = scalar_lea.sflag [#allocation6], %s1443_s3 }
  0x38   : > { %902 = vmatmul.msk.bf16.vlgmr.msra.gmra.mxu0 %vm387_vm0, %v371_v5  ;;  %911 = vmatmul.msk.bf16.vlgmr.msra.gmra.mxu1 %vm387_vm0, %v371_v5 }
  0xb5   : > { %v400_v8 = vpop.f32.mrf.mxu0  ;;  %v444_v9 = vpop.f32.mrf.mxu1 }
  0xb6   : > { %v401_v10 = vadd.f32 %v1044_v6, %v400_v8  ;;  %v445_v11 = vadd.f32 %v1045_v7, %v444_v9 }
  0xb8   : > { %v404_v12 = vpack.c.bf16 %v401_v10, %v401_v10  ;;  %v448_v13 = vpack.c.bf16 %v445_v11, %v445_v11 }
  0xba   : > { %406 = vst.msk [vmem:[#allocation2] sm:$0xf] %vm405_vm1, %v404_v12  ;;  %v512_v14 = vunpack.c.l.b16 %v448_v13 }
  0xbc   : > { %v513_v15 = vpack.c.b16 %v512_v14, %v512_v14 }
  0xbd   : > { %v402_v16 = vpop.f32.mrf.mxu0  ;;  %v446_v17 = vpop.f32.mrf.mxu1 }
  0xbe   : > { %514 = vrot.lane.b32.xlu2 %v513_v15, %s1280_s15 }
  0xc1   : > { %v449_v18 = vld [vmem:[#allocation2] sm:$0xf] }
  0xc2   : > { %v580_v19 = vld [vmem:[#allocation2] sm:$0xf]  ;;  %v455_v20 = vsel %vm450_vm2, %v449_v18, 0  ;;  %v483_v21 = vunpack.c.l.b16 %v449_v18 }
  0xc3   : > { %v584_v22 = vunpack.c.l.b16 %v580_v19  ;;  %464 = vmatpush.bf16.xpose.msra.mxu2 %v455_v20  ;;  %v510_v25 = vld [vmem:[#allocation2] sm:$0xf] }
  0xc4   : > { %v484_v24 = vpack.c.b16 %v483_v21, %v483_v21  ;;  %v517_v26 = vunpack.c.l.b16 %v510_v25  ;;  %v647_v47 = vld [vmem:[#allocation2] sm:$0xf] }
  0xc5   : > { %v1470_v23 = vpack.c.b16 %v584_v22, %v584_v22  ;;  %v651_v48 = vunpack.c.l.b16 %v647_v47 }
  0xc6   : > { %485 = vrot.lane.b32.xlu1 %v484_v24, %s1282_s16  ;;  %v1474_v27 = vpack.c.b16 %v517_v26, %v517_v26 }
  0xc7   : > { %586 = vrot.lane.b32.xlu2 %v1470_v23, %s1281_s23  ;;  %v652_v49 = vpack.c.b16 %v651_v48, %v651_v48 }
  0xca   : > { %912 = vmatmul.msk.bf16.vlgmr.msra.gmra.mxu2 %vm450_vm2, %v448_v13 }
  0xce   : > { %519 = vrot.lane.b32.xlu1 %v1474_v27, %s1280_s15  ;;  %s764_s15 = scalar_lea.hbm %s1555_s7, %s930_s12 }
  0xcf   : > { %648 = vrot.lane.b32.xlu2 %v513_v15, %s1283_s30 }
  0xd6   : > { %581 = vrot.lane.b32.xlu1 %v513_v15, %s1281_s23 }
 0x118   : > { %v515_v28 = vpop.permute.xlu2 %514 }
 0x121   : > { %v587_v29 = vpop.permute.xlu2 %586 }
 0x122   : > { %v592_v30 = vsel %vm450_vm2, %v587_v29, 0 }
 0x123   : > { %601 = vmatpush.bf16.xpose.msrb.mxu1 %v592_v30 }
 0x129   : > { %v649_v50 = vpop.permute.xlu2 %648 }
 0x138   : > { %v486_v31 = vpop.permute.xlu1 %485 }
 0x139   : > { %v492_v32 = vsel %vm490_vm3, %v486_v31, 0 }
 0x13a   : > { %501 = vmatpush.bf16.msra.mxu3 %v492_v32 }
 0x140   : > { %v520_v33 = vpop.permute.xlu1 %519 }
 0x141   : > { %v525_v34 = vsel %vm450_vm2, %v520_v33, 0 }
 0x142   : > { %534 = vmatpush.bf16.xpose.msrb.mxu3 %v525_v34 }
 0x148   : > { %v582_v35 = vpop.permute.xlu1 %581 }
 0x149   : > { %916 = vmatmul.msk.bf16.vlgmr.msrb.gmra.mxu1 %vm450_vm2, %v582_v35 }
 0x14d   : > { %v466_v36 = vpop.f32.mrf.mxu2 }
 0x14e   : > { %v470_v37 = vsel %vm450_vm2, %v466_v36, -inf }
 0x14f   : > { %471 = vmax.xlane.f32.xlu0 %v470_v37 }
 0x155   : > { %v468_v38 = vpop.f32.mrf.mxu2 }
 0x1c2   : > { %v472_v39 = vpop.xlane.xlu0 %471 }
 0x1c3   : > { %v473_v40 = vsub.f32 %v466_v36, %v472_v39 }
 0x1c5   : > { %v474_v41 = vmul.f32 1.442695, %v473_v40 }
 0x1c6   : > { %v603_v42 = vpop.f32.mrf.mxu1 }
 0x1c7   : > { %1047 = vpow2.f32 %v474_v41  ;;  %v607_v43 = vsel %vm450_vm2, %v603_v42, -inf }
 0x1c8   : > { %608 = vmax.xlane.f32.xlu2 %v607_v43 }
 0x1cd   : > { %v1048_v44 = vpop.eup %1047 }
 0x1ce   : > { %v605_v45 = vpop.f32.mrf.mxu1  ;;  %v476_v46 = vsel %vm450_vm2, %v1048_v44, 0.0 }
 0x1cf   : > { %477 = vadd.xlane.f32.xlu0 %v476_v46  ;;  %v937_v45 = vld [vmem:[#allocation10] sm:$0xff] }
 0x1e3   : > { %653 = vrot.lane.b32.xlu0 %v652_v49, %s1283_s30  ;;  %s359_s30 = scalar_lea.vmem [#allocation12], %s889_s10  ;;  %s1203_s10 = scalar_lea.hbm %s1555_s7, 16 }
 0x23b   : > { %v609_v51 = vpop.xlane.xlu2 %608 }
 0x23c   : > { %v610_v52 = vsub.f32 %v603_v42, %v609_v51 }
 0x23e   : > { %v611_v53 = vmul.f32 1.442695, %v610_v52 }
 0x240   : > { %1049 = vpow2.f32 %v611_v53 }
 0x242   : > { %v478_v54 = vpop.xlane.xlu0 %477 }
 0x243   : > { %1051 = vrcp.f32 %v478_v54 }
 0x246   : > { %v1050_v55 = vpop.eup %1049 }
 0x247   : > { %v613_v56 = vsel %vm450_vm2, %v1050_v55, 0.0 }
 0x248   : > { %614 = vadd.xlane.f32.xlu2 %v613_v56 }
 0x249   : > { %v1052_v57 = vpop.eup %1051 }
 0x24a   : > { %v480_v58 = vmul.f32 %v1052_v57, %v1048_v44  ;;  %v938_v44 = vld [vmem:[#allocation10 + $0x8] sm:$0xff] }
 0x24b   : > { %744 = vmatpush.bf16.msra.mxu1 %v938_v44 }
 0x24c   : > { %v481_v59 = vpack.c.bf16 %v480_v58, %v480_v58 }
 0x24e   : > { %913 = vmatmul.msk.bf16.vlgmr.msra.gmra.mxu3 %vm450_vm2, %v481_v59 }
 0x24f   : > { %745 = vmatpush.bf16.msra.mxu1 %v937_v45 }
 0x255   : > { %v654_v60 = vpop.permute.xlu0 %653 }
 0x256   : > { %v659_v61 = vsel %vm450_vm2, %v654_v60, 0 }
 0x257   : > { %668 = vmatpush.bf16.xpose.msra.mxu3 %v659_v61 }
 0x25e   : > { %914 = vmatmul.msk.bf16.vlgmr.msrb.gmra.mxu3 %vm450_vm2, %v515_v28 }
 0x26e   : > { %918 = vmatmul.msk.bf16.vlgmr.msra.gmra.mxu3 %vm450_vm2, %v649_v50  ;;  %v1046_v50 = vld [vmem:[%s1554_s6] ss:$0 sm:$0xff] }
 0x2bb   : > { %v615_v19 = vpop.xlane.xlu2 %614 }
 0x2d1   : > { %v503_v62 = vpop.f32.mrf.mxu3 }
 0x2d2   : > { %v507_v63 = vpack.c.bf16 %v503_v62, %v503_v62 }
 0x2d4   : > { %509 = vst.msk [vmem:[#allocation3] sm:$0xf] %vm508_vm4, %v507_v63 }
 0x2d9   : > { %v505_v0 = vpop.f32.mrf.mxu3 }
 0x2e1   : > { %v536_v1 = vpop.f32.mrf.mxu3 }
 0x2e2   : > { %v540_v2 = vsel %vm450_vm2, %v536_v1, -inf }
 0x2e3   : > { %541 = vmax.xlane.f32.xlu1 %v540_v2 }
 0x2e9   : > { %v538_v3 = vpop.f32.mrf.mxu3 }
 0x2f1   : > { %v670_v4 = vpop.f32.mrf.mxu3 }
 0x2f2   : > { %v674_v5 = vsel %vm450_vm2, %v670_v4, -inf }
 0x2f3   : > { %675 = vmax.xlane.f32.xlu0 %v674_v5 }
 0x2f9   : > { %v672_v6 = vpop.f32.mrf.mxu3 }
 0x2fc   : > { %552 = vrot.lane.b32.xlu1 %v1474_v27, %s1284_s19  ;;  %s766_s19 = sshll.u32 %s359_s30, 4  ;;  %s767_s19 = int_to_ptr.vmem [resolvable:$true] %s766_s19 }
 0x356   : > { %v542_v7 = vpop.xlane.xlu1 %541 }
 0x357   : > { %v543_v8 = vsub.f32 %v536_v1, %v542_v7 }
 0x359   : > { %v544_v9 = vmul.f32 1.442695, %v543_v8 }
 0x35b   : > { %1053 = vpow2.f32 %v544_v9 }
 0x361   : > { %v1054_v10 = vpop.eup %1053 }
 0x362   : > { %v546_v11 = vsel %vm450_vm2, %v1054_v10, 0.0 }
 0x363   : > { %547 = vadd.xlane.f32.xlu2 %v546_v11 }
 0x366   : > { %v676_v12 = vpop.xlane.xlu0 %675 }
 0x367   : > { %v677_v13 = vsub.f32 %v670_v4, %v676_v12 }
 0x369   : > { %v678_v14 = vmul.f32 1.442695, %v677_v13 }
 0x36b   : > { %1055 = vpow2.f32 %v678_v14 }
 0x36c   : > { %1057 = vrcp.f32 %v615_v19 }
 0x36e   : > { %v553_v15 = vpop.permute.xlu1 %552 }
 0x36f   : > { %v558_v16 = vsel %vm490_vm3, %v553_v15, 0 }
 0x370   : > { %567 = vmatpush.bf16.msrb.mxu0 %v558_v16 }
 0x371   : > { %v1056_v17 = vpop.eup %1055 }
 0x372   : > { %v680_v18 = vsel %vm450_vm2, %v1056_v17, 0.0  ;;  %v1058_v21 = vpop.eup %1057 }
 0x373   : > { %681 = vadd.xlane.f32.xlu0 %v680_v18  ;;  %v617_v24 = vmul.f32 %v1058_v21, %v1050_v55 }
 0x375   : > { %v618_v29 = vpack.c.bf16 %v617_v24, %v617_v24 }
 0x37b   : > { %619 = vrot.lane.b32.xlu2 %v1470_v23, %s1285_s11  ;;  %s768_s11 = sshll.u32 %s764_s15, 4  ;;  %s769_s11 = int_to_ptr.hbm [resolvable:$true] %s768_s11 }
 0x387   : > { %686 = vrot.lane.b32.xlu0 %v652_v49, %s1286_s17  ;;  %s1197_s17 = sshra.s32 %s769_s11, 4  ;;  %s1198_s17 = int_to_ptr.hbm [resolvable:$true] %s1197_s17 }
 0x388   : > { %p1204_p10 = scmp.lt.s32.totalorder %s1198_s17, %s1555_s7 }
 0x3d6   : > { %v548_v20 = vpop.xlane.xlu2 %547 }
 0x3d7   : > { %1059 = vrcp.f32 %v548_v20 }
 0x3dd   : > { %v1060_v22 = vpop.eup %1059 }
 0x3de   : > { %v550_v25 = vmul.f32 %v1060_v22, %v1054_v10  ;;  %v620_v26 = vpop.permute.xlu2 %619 }
 0x3df   : > { %v625_v27 = vsel %vm490_vm3, %v620_v26, 0 }
 0x3e0   : > { %634 = vmatpush.bf16.msrb.mxu2 %v625_v27  ;;  %v551_v28 = vpack.c.bf16 %v550_v25, %v550_v25 }
 0x3e2   : > { %915 = vmatmul.msk.bf16.vlgmr.msrb.gmra.mxu0 %vm450_vm2, %v551_v28 }
 0x3e3   : > { %917 = vmatmul.msk.bf16.vlgmr.msrb.gmra.mxu2 %vm450_vm2, %v618_v29 }
 0x3e6   : > { %v682_v23 = vpop.xlane.xlu0 %681 }
 0x3e7   : > { %1061 = vrcp.f32 %v682_v23 }
 0x3ed   : > { %v1062_v30 = vpop.eup %1061 }
 0x3ee   : > { %v684_v31 = vmul.f32 %v1062_v30, %v1056_v17 }
 0x3f0   : > { %v685_v34 = vpack.c.bf16 %v684_v31, %v684_v31 }
 0x3f9   : > { %v687_v32 = vpop.permute.xlu0 %686 }
 0x3fa   : > { %v692_v33 = vsel %vm490_vm3, %v687_v32, 0 }
 0x3fb   : > { %701 = vmatpush.bf16.msra.mxu0 %v692_v33 }
 0x3fe   : > { %919 = vmatmul.msk.bf16.vlgmr.msra.gmra.mxu0 %vm450_vm2, %v685_v34 }
 0x45f   : > { %v569_v35 = vpop.f32.mrf.mxu0 }
 0x460   : > { %v573_v36 = vpack.c.bf16 %v569_v35, %v569_v35 }
 0x462   : > { %575 = vrot.lane.b32.xlu1 %v573_v36, %s1287_s9  ;;  %s1199_s9 = scalar_lea.hbm %s1198_s17, 8 }
 0x463   : > { %p1200_p1 = scmp.ne.s32.totalorder %s1198_s17, %s1199_s9  ;;  %p1205_p11 = scmp.lt.s32.totalorder %s1203_s10, %s1199_s9 }
 0x465   : > { %p1201_p3 = pnand %p1200_p1, %p1421_p4  ;;  %p1206_p12 = por %p1205_p11, %p1204_p10 }
 0x466   : > { %v636_v37 = vpop.f32.mrf.mxu2 }
 0x467   : > { %v640_v38 = vpack.c.bf16 %v636_v37, %v636_v37  ;;  %v571_v39 = vpop.f32.mrf.mxu0  ;;  %p1202_p9 = pneg %p1201_p3 }
 0x469   : > { %p1207_p13 = pnand %p1206_p12, %p1202_p9 }
 0x46a   : > { %642 = vrot.lane.b32.xlu1 %v640_v38, %s1288_s13 }
 0x46e   : > { %v638_v40 = vpop.f32.mrf.mxu2 }
 0x47b   : > { %v703_v41 = vpop.f32.mrf.mxu0 }
 0x47c   : > { %v707_v42 = vpack.c.bf16 %v703_v41, %v703_v41 }
 0x47e   : > { %709 = vrot.lane.b32.xlu2 %v707_v42, %s1289_s1 }
 0x483   : > { %v705_v43 = vpop.f32.mrf.mxu0 }
 0x4d4   : > { %v576_v46 = vpop.permute.xlu1 %575 }
 0x4d5   : > { %579 = vst.msk [vmem:[#allocation3] sm:$0xf] %vm578_vm5, %v576_v46 }
 0x4d8   : > { %v710_v48 = vpop.permute.xlu2 %709 }
 0x4dc   : > { %v643_v47 = vpop.permute.xlu1 %642 }
 0x4dd   : > { %646 = vst.msk [vmem:[#allocation3] sm:$0xf] %vm645_vm6, %v643_v47 }
 0x4de   : > { %713 = vst.msk [vmem:[#allocation3] sm:$0xf] %vm712_vm7, %v710_v48 }
 0x4e5   : > { %v714_v49 = vld [vmem:[#allocation3] sm:$0xf] }
 0x4e6   : > { %928 = vmatmul.msk.bf16.vlgmr.msra.gmra.mxu1 %vm387_vm0, %v714_v49 }
 0x563   : > { %v747_v51 = vpop.f32.mrf.mxu1 }
 0x564   : > { %v748_v52 = vadd.f32 %v1046_v50, %v747_v51 }
 0x566   : > { %751 = vst.msk [vmem:[%s359_s30] sm:$0xff] %vm387_vm0, %v748_v52 }
 0x567   : > { %1210 = shalt.err (!%p1207_p13)
}
 0x568   : > { %953 = dma.vmem_to_hbm [thread:$0]  (%p1421_p4), %s767_s19, 128, %s769_s11, %s753_s27  }
 0x56b   : > { %v749_v53 = vpop.f32.mrf.mxu1 }
 0x56c PF: > { %s780_s3 = sand.u32 1, %s1253_s24   ;;  %p970_p0 = pnand %p885_p6, %p1429_p7 }
 0x56d   : > { %s781_s18 = scalar_lea.sflag [#allocation6], %s780_s3 }
 0x56e   : > { %p971_p2 = pneg %p970_p0 }
 0x570   : > { %1248 = dma.done.wait (%p971_p2), %s781_s18, 128  }
 0x571   : > { %1250 = vsyncadd (%p971_p2), %s781_s18, 4294967168  ;;  %s25_s29 = sadd.s32 1, %s1273_s29   ;;  %s1567_s24 = smov %s1257_s25 }
 0x572   : > { %p22_p5 = scmp.ge.s32.totalorder %s25_s29, 4   ;;  %s1568_s25 = smov %s1261_s26 }
 0x573   : > { %s1569_s26 = smov %s1427_s21  ;;  %s1570_s27 = smov %s1269_s28 }
 0x574   : > { %s1571_s28 = smov %s1573_s14  ;;  %24 = sbr.rel (!%p22_p5) target bundleno = 11 (0xb), region = 110 }
 0x579   :  { %787 = vsyncpa [#allocation5], 1 }
 0x57a   :  { %789 = vsyncpa [#allocation5 + $0x1], 1 }
 0x57b   :  { %790 = vsyncpa [#allocation8], 1 }
 0x57c   :  { %791 = vsyncpa [#allocation11], 1 }
 0x57d   :  { %792 = vsyncpa [#allocation6], 1 }
 0x57e   :  { %794 = vsyncpa [#allocation6 + $0x1], 1 }

</bundles_post_ra>
